<compile_context>
chip_gen: v5e
topology: v5e:2x2
jax: 0.10.0
libtpu: 0.0.40
codegen_flags: <defaults>
</compile_context>

<pallas_src>
import functools

import jax
import jax.numpy as jnp
from jax.experimental import pallas as pl
from jax.experimental.pallas import tpu as pltpu


_FUSE_K_MAX = 256          # fuse the 9 taps into one matmul only while 9*Cin_p <= this
_LANE_PACK_TARGET = 4096   # max packed lane length per grid step (batch packing)


def _round_up(n, m):
    return (n + m - 1) // m * m


def _choose_pack(n, hw, target=_LANE_PACK_TARGET):
    """Largest divisor P of n with P*hw <= target (always >= 1)."""
    best = 1
    for p in range(1, n + 1):
        if n % p == 0 and p * hw <= max(target, hw):
            best = p
    return best


def _vmem_limit_bytes():
    # Raise the scoped-VMEM limit toward physical capacity, leaving headroom:
    # ~100 MiB on v5e/v6e (128 MiB physical), ~56 MiB on v7x (64 MiB physical).
    try:
        cap = pltpu.get_tpu_info().vmem_capacity_bytes
    except Exception:  # noqa: BLE001 - conservative default if query unavailable
        cap = 64 * 1024 * 1024
    return int(min(cap - 8 * 1024 * 1024, 100 * 1024 * 1024))


def _make_kernel(W, L, Cout, fuse1, fuse2):
    taps = [(dh - 1, dw - 1) for dh in range(3) for dw in range(3)]  # tap t = dh*3+dw

    def kernel(masks_ref, x_ref, w1_ref, b1_ref, w2_ref, b2_ref, o_ref):
        # masks_ref : (9, 1, L)        0/1 halo masks per tap (compute dtype)
        # x_ref     : (1, Cin_p, L)    packed input, channels x packed-lanes
        # w1_ref    : (Cmid_p, 9*Cin_p) if fused else (9, Cmid_p, Cin_p)
        # b1_ref    : (Cmid_p, 1)      folded BN1 bias (f32)
        # w2_ref    : (Cout, 9*Cmid_p) if fused else (9, Cout, Cmid_p)
        # b2_ref    : (Cout, 1)        folded BN2 bias (f32)
        # o_ref     : (1, Cout, L)     output (L % 128 == 0 -> lane-dense stores)
        xv = x_ref[0]                                  # (Cin_p, L)

        def shifted_tap(a, t):
            r, c = taps[t]
            off = r * W + c                            # flat spatial offset
            if off == 0:
                return a                               # centre tap: mask all-ones
            # XLU lane rotation; the circular wrap (including cross-image wrap
            # from batch packing and the lane pad) lands exactly on masked
            # border positions, so this is the zero-padded 3x3 window.
            return pltpu.roll(a, (-off) % L, axis=1) * masks_ref[t]

        def conv(a, w_ref, b_ref, fused):
            if fused:
                # Small C: one MXU push over a (9*Cin_p, L) im2col stack.
                im2col = jnp.concatenate([shifted_tap(a, t) for t in range(9)], 0)
                acc = jnp.dot(w_ref[...], im2col,
                              preferred_element_type=jnp.float32)
            else:
                # Large C: 9 per-tap matmuls (K = C fills the MXU) accumulated
                # in f32 -- avoids the multi-MB im2col intermediate / spills.
                acc = jnp.dot(w_ref[4], a, preferred_element_type=jnp.float32)
                for t in range(9):
                    if t == 4:
                        continue
                    acc = acc + jnp.dot(w_ref[t], shifted_tap(a, t),
                                        preferred_element_type=jnp.float32)
            return acc + b_ref[...]                    # folded BN bias (f32, VPU)

        out1 = conv(xv, w1_ref, b1_ref, fuse1)                       # conv1 + BN1
        out2 = conv(out1.astype(xv.dtype), w2_ref, b2_ref, fuse2)    # conv2 + BN2
        out2 = out2 + xv[:Cout, :].astype(jnp.float32)               # + identity
        # NOTE: BasicBlock spec has no ReLU.
        o_ref[0] = out2.astype(o_ref.dtype)            # lane-dense store

    return kernel


def _fold_bn(gamma, beta, mean, var, eps):
    scale = (gamma / jnp.sqrt(var + eps)).astype(jnp.float32)
    bias = (beta - mean * scale).astype(jnp.float32)
    return scale, bias


def _prep_weight(w_oihw, scale, cin, cin_p, cout, cout_p, fused, compute_dtype):
    wf = w_oihw.astype(jnp.float32) * scale[:, None, None, None]   # (Co, Ci, 3, 3)
    wf = jnp.transpose(wf, (0, 2, 3, 1))                           # (Co, 3, 3, Ci)
    wf = jnp.pad(wf, ((0, cout_p - cout), (0, 0), (0, 0), (0, cin_p - cin)))
    if fused:
        return wf.reshape(cout_p, 9 * cin_p).astype(compute_dtype)
    # Per-tap layout (9, Co, Ci): kernel indexes the leading dim -> no lane slices.
    return jnp.transpose(wf.reshape(cout_p, 9, cin_p), (1, 0, 2)).astype(compute_dtype)


def _const_spec(shape, const_buffering):
    zeros = (0,) * len(shape)
    kwargs = {}
    if const_buffering is not None:
        # Constant-index inputs are fetched once; don't double-buffer them.
        kwargs["pipeline_mode"] = pl.Buffered(buffer_count=const_buffering)
    return pl.BlockSpec(shape, lambda g: zeros, **kwargs)


def basic_block_forward(x_nchw, w1_oihw, w2_oihw, bn1_params, bn2_params, *,
                        eps=1e-5, compute_dtype=jnp.float32, out_dtype=None,
                        const_buffering=1, set_vmem_limit=True):
    N, Cin, H, W = x_nchw.shape
    Cmid = w1_oihw.shape[0]
    Cout = w2_oihw.shape[0]
    assert Cin == Cout, "downsample=None requires inplanes == planes"
    HW = H * W
    out_dtype = x_nchw.dtype if out_dtype is None else out_dtype

    # Sublane tile (f32: 8, bf16: 16) keeps every im2col piece tile-aligned.
    sub = 8 * (4 // jnp.dtype(compute_dtype).itemsize)
    Cin_p = _round_up(Cin, sub)
    Cmid_p = _round_up(Cmid, sub)

    # Shape-dependent conv strategy (see header comment).
    fuse1 = 9 * Cin_p <= _FUSE_K_MAX
    fuse2 = 9 * Cmid_p <= _FUSE_K_MAX

    # Batch packing along the lane axis; pad packed lanes to a multiple of 128.
    P = _choose_pack(N, HW)
    G = N // P
    L = _round_up(P * HW, 128)

    s1, b1 = _fold_bn(*bn1_params, eps)
    s2, b2 = _fold_bn(*bn2_params, eps)

    w1r = _prep_weight(w1_oihw, s1, Cin, Cin_p, Cmid, Cmid_p, fuse1, compute_dtype)
    w2r = _prep_weight(w2_oihw, s2, Cmid, Cmid_p, Cout, Cout, fuse2, compute_dtype)
    b1p = jnp.pad(b1, (0, Cmid_p - Cmid)).reshape(Cmid_p, 1)
    b2p = b2.reshape(Cout, 1)

    # Pack the batch: (N, C, HW) -> (G, Cin_p, P*HW) -> pad lanes to L.
    x = x_nchw.reshape(N, Cin, HW).astype(compute_dtype)
    x = jnp.pad(x, ((0, 0), (0, Cin_p - Cin), (0, 0)))
    xp = x.reshape(G, P, Cin_p, HW).transpose(0, 2, 1, 3).reshape(G, Cin_p, P * HW)
    xp = jnp.pad(xp, ((0, 0), (0, 0), (0, L - P * HW)))

    # 0/1 halo masks per tap, tiled per packed image (compile-time constants).
    hh = jnp.arange(H, dtype=jnp.int32)
    ww = jnp.arange(W, dtype=jnp.int32)
    rows = []
    for dh in range(3):
        for dw in range(3):
            r, c = dh - 1, dw - 1
            mh = (hh + r >= 0) & (hh + r < H)
            mw = (ww + c >= 0) & (ww + c < W)
            rows.append((mh[:, None] & mw[None, :]).reshape(HW))
    masks = jnp.stack(rows).astype(compute_dtype)                    # (9, HW)
    masks = jnp.pad(jnp.tile(masks, (1, P)), ((0, 0), (0, L - P * HW)))
    masks = masks.reshape(9, 1, L)

    compiler_kwargs = dict(dimension_semantics=("parallel",))
    if set_vmem_limit:
        compiler_kwargs["vmem_limit_bytes"] = _vmem_limit_bytes()

    out = pl.pallas_call(
        _make_kernel(W, L, Cout, fuse1, fuse2),
        out_shape=jax.ShapeDtypeStruct((G, Cout, L), out_dtype),
        grid_spec=pltpu.PrefetchScalarGridSpec(
            num_scalar_prefetch=0,
            grid=(G,),
            in_specs=[
                _const_spec(masks.shape, const_buffering),
                pl.BlockSpec((1, Cin_p, L), lambda g: (g, 0, 0)),
                _const_spec(w1r.shape, const_buffering),
                _const_spec(b1p.shape, const_buffering),
                _const_spec(w2r.shape, const_buffering),
                _const_spec(b2p.shape, const_buffering),
            ],
            out_specs=pl.BlockSpec((1, Cout, L), lambda g: (g, 0, 0)),
        ),
        compiler_params=pltpu.CompilerParams(**compiler_kwargs),
    )(masks, xp, w1r, b1p, w2r, b2p)

    # Unpack: slice off the lane pad, undo the batch packing.
    out = out[:, :, :P * HW].reshape(G, Cout, P, HW)
    out = out.transpose(0, 2, 1, 3).reshape(N, Cout, H, W)
    return out


def basic_block_ref(x, w1, w2, bn1, bn2, eps=1e-5):
    """Pure-JAX reference (NCHW), matching the PyTorch forward."""
    def conv(x, w):
        return jax.lax.conv_general_dilated(
            x, w, (1, 1), ((1, 1), (1, 1)),
            dimension_numbers=("NCHW", "OIHW", "NCHW"),
            precision=jax.lax.Precision.HIGHEST)

    def bn(x, gamma, beta, mean, var):
        g = gamma[None, :, None, None]
        b = beta[None, :, None, None]
        m = mean[None, :, None, None]
        v = var[None, :, None, None]
        return (x - m) / jnp.sqrt(v + eps) * g + b

    out = bn(conv(x, w1), *bn1)
    out = bn(conv(out, w2), *bn2)
    return out + x


def _run_block(x, w1, w2, bn1, bn2, **kw):
    # Try single-buffered constants + explicit VMEM limit first; fall back to
    # progressively more conservative configs if the installed jax/compiler
    # rejects them (keeps the kernel runnable across jax / TPU generations).
    configs = ((1, True), (None, True), (None, False))
    last_err = None
    for cb, vl in configs:
        try:
            fwd = jax.jit(functools.partial(
                basic_block_forward, const_buffering=cb, set_vmem_limit=vl, **kw))
            return jax.block_until_ready(fwd(x, w1, w2, bn1, bn2))
        except Exception as e:  # noqa: BLE001 - deliberate config fallback
            last_err = e
    raise last_err


if __name__ == "__main__":
    key = jax.random.PRNGKey(0)
    ks = jax.random.split(key, 11)

    def make_inputs(N, Cin, Cmid, Cout, H, W):
        x = jax.random.normal(ks[0], (N, Cin, H, W), jnp.float32)
        w1 = 0.1 * jax.random.normal(ks[1], (Cmid, Cin, 3, 3), jnp.float32)
        w2 = 0.1 * jax.random.normal(ks[2], (Cout, Cmid, 3, 3), jnp.float32)
        bn1 = (1.0 + 0.1 * jax.random.normal(ks[3], (Cmid,), jnp.float32),
               0.1 * jax.random.normal(ks[4], (Cmid,), jnp.float32),
               0.1 * jax.random.normal(ks[5], (Cmid,), jnp.float32),
               jax.random.uniform(ks[6], (Cmid,), jnp.float32, 0.5, 1.5))
        bn2 = (1.0 + 0.1 * jax.random.normal(ks[7], (Cout,), jnp.float32),
               0.1 * jax.random.normal(ks[8], (Cout,), jnp.float32),
               0.1 * jax.random.normal(ks[9], (Cout,), jnp.float32),
               jax.random.uniform(ks[10], (Cout,), jnp.float32, 0.5, 1.5))
        return x, w1, w2, bn1, bn2

    # 1) Primary toy case (fused-im2col path): inplanes=4, midplanes=8, planes=4.
    x, w1, w2, bn1, bn2 = make_inputs(2, 4, 8, 4, 16, 16)
    out = _run_block(x, w1, w2, bn1, bn2)
    ref = basic_block_ref(x, w1, w2, bn1, bn2)
    assert out.shape == ref.shape, out.shape
    err = float(jnp.max(jnp.abs(out - ref)))
    if err > 2e-2:
        raise AssertionError(f"f32 fused path mismatch: max abs err {err}")

    # 2) Per-tap accumulation path (9*Cin_p > threshold) at a small spatial size.
    x2, w12, w22, bn12, bn22 = make_inputs(2, 32, 32, 32, 8, 8)
    out2 = _run_block(x2, w12, w22, bn12, bn22)
    ref2 = basic_block_ref(x2, w12, w22, bn12, bn22)
    err2 = float(jnp.max(jnp.abs(out2 - ref2)))
    if err2 > 5e-2:
        raise AssertionError(f"f32 per-tap path mismatch: max abs err {err2}")

    # 3) bf16 compute path (loose tolerance; accumulation / BN / residual in f32).
    out3 = _run_block(x, w1, w2, bn1, bn2, compute_dtype=jnp.bfloat16)
    err3 = float(jnp.max(jnp.abs(out3.astype(jnp.float32) - ref)))
    if err3 > 2e-1:
        raise AssertionError(f"bf16 path mismatch: max abs err {err3}")

    print("KERNEL_OK")
</pallas_src>

<mosaic_0001>
module attributes {stable_mosaic.version = 11 : i64} {
  func.func @kernel(%arg0: i32, %arg1: memref<9x1x512xf32, #tpu.memory_space<vmem>>, %arg2: memref<1x8x512xf32, #tpu.memory_space<vmem>>, %arg3: memref<8x72xf32, #tpu.memory_space<vmem>>, %arg4: memref<8x1xf32, #tpu.memory_space<vmem>>, %arg5: memref<4x72xf32, #tpu.memory_space<vmem>>, %arg6: memref<4x1xf32, #tpu.memory_space<vmem>>, %arg7: memref<1x4x512xf32, #tpu.memory_space<vmem>>) attributes {dimension_semantics = [#tpu.dimension_semantics<parallel>], iteration_bounds = array<i64: 1>, scalar_prefetch = 0 : i64, scratch_operands = 0 : i64, tpu.core_type = #tpu.core_type<tc>, window_params = [{pipeline_mode = #tpu.pipeline_mode<synchronous>, transform_indices = @transform_0, window_bounds = array<i64: 9, 1, 512>}, {transform_indices = @transform_1, window_bounds = array<i64: 1, 8, 512>}, {pipeline_mode = #tpu.pipeline_mode<synchronous>, transform_indices = @transform_2, window_bounds = array<i64: 8, 72>}, {pipeline_mode = #tpu.pipeline_mode<synchronous>, transform_indices = @transform_3, window_bounds = array<i64: 8, 1>}, {pipeline_mode = #tpu.pipeline_mode<synchronous>, transform_indices = @transform_4, window_bounds = array<i64: 4, 72>}, {pipeline_mode = #tpu.pipeline_mode<synchronous>, transform_indices = @transform_5, window_bounds = array<i64: 4, 1>}, {transform_indices = @transform_6, window_bounds = array<i64: 1, 4, 512>}]} {
    %c0 = arith.constant 0 : index
    %c0_0 = arith.constant 0 : index
    %c0_1 = arith.constant 0 : index
    %0 = vector.load %arg2[%c0, %c0_0, %c0_1] : memref<1x8x512xf32, #tpu.memory_space<vmem>>, vector<1x8x512xf32>
    %1 = vector.shape_cast %0 : vector<1x8x512xf32> to vector<8x512xf32>
    %c17_i32 = arith.constant 17 : i32
    %2 = tpu.dynamic_rotate %1 by %c17_i32 dim 1 : vector<8x512xf32>, i32 -> vector<8x512xf32>
    %c0_2 = arith.constant 0 : index
    %c0_3 = arith.constant 0 : index
    %c0_4 = arith.constant 0 : index
    %3 = vector.load %arg1[%c0_2, %c0_3, %c0_4] : memref<9x1x512xf32, #tpu.memory_space<vmem>>, vector<1x1x512xf32>
    %4 = vector.shape_cast %3 : vector<1x1x512xf32> to vector<1x512xf32>
    %5 = vector.broadcast %4 : vector<1x512xf32> to vector<8x512xf32>
    %6 = arith.mulf %2, %5 : vector<8x512xf32>
    %c16_i32 = arith.constant 16 : i32
    %7 = tpu.dynamic_rotate %1 by %c16_i32 dim 1 : vector<8x512xf32>, i32 -> vector<8x512xf32>
    %c1 = arith.constant 1 : index
    %c0_5 = arith.constant 0 : index
    %c0_6 = arith.constant 0 : index
    %8 = vector.load %arg1[%c1, %c0_5, %c0_6] : memref<9x1x512xf32, #tpu.memory_space<vmem>>, vector<1x1x512xf32>
    %9 = vector.shape_cast %8 : vector<1x1x512xf32> to vector<1x512xf32>
    %10 = vector.broadcast %9 : vector<1x512xf32> to vector<8x512xf32>
    %11 = arith.mulf %7, %10 : vector<8x512xf32>
    %c15_i32 = arith.constant 15 : i32
    %12 = tpu.dynamic_rotate %1 by %c15_i32 dim 1 : vector<8x512xf32>, i32 -> vector<8x512xf32>
    %c2 = arith.constant 2 : index
    %c0_7 = arith.constant 0 : index
    %c0_8 = arith.constant 0 : index
    %13 = vector.load %arg1[%c2, %c0_7, %c0_8] : memref<9x1x512xf32, #tpu.memory_space<vmem>>, vector<1x1x512xf32>
    %14 = vector.shape_cast %13 : vector<1x1x512xf32> to vector<1x512xf32>
    %15 = vector.broadcast %14 : vector<1x512xf32> to vector<8x512xf32>
    %16 = arith.mulf %12, %15 : vector<8x512xf32>
    %c1_i32 = arith.constant 1 : i32
    %17 = tpu.dynamic_rotate %1 by %c1_i32 dim 1 : vector<8x512xf32>, i32 -> vector<8x512xf32>
    %c3 = arith.constant 3 : index
    %c0_9 = arith.constant 0 : index
    %c0_10 = arith.constant 0 : index
    %18 = vector.load %arg1[%c3, %c0_9, %c0_10] : memref<9x1x512xf32, #tpu.memory_space<vmem>>, vector<1x1x512xf32>
    %19 = vector.shape_cast %18 : vector<1x1x512xf32> to vector<1x512xf32>
    %20 = vector.broadcast %19 : vector<1x512xf32> to vector<8x512xf32>
    %21 = arith.mulf %17, %20 : vector<8x512xf32>
    %c511_i32 = arith.constant 511 : i32
    %22 = tpu.dynamic_rotate %1 by %c511_i32 dim 1 : vector<8x512xf32>, i32 -> vector<8x512xf32>
    %c5 = arith.constant 5 : index
    %c0_11 = arith.constant 0 : index
    %c0_12 = arith.constant 0 : index
    %23 = vector.load %arg1[%c5, %c0_11, %c0_12] : memref<9x1x512xf32, #tpu.memory_space<vmem>>, vector<1x1x512xf32>
    %24 = vector.shape_cast %23 : vector<1x1x512xf32> to vector<1x512xf32>
    %25 = vector.broadcast %24 : vector<1x512xf32> to vector<8x512xf32>
    %26 = arith.mulf %22, %25 : vector<8x512xf32>
    %c497_i32 = arith.constant 497 : i32
    %27 = tpu.dynamic_rotate %1 by %c497_i32 dim 1 : vector<8x512xf32>, i32 -> vector<8x512xf32>
    %c6 = arith.constant 6 : index
    %c0_13 = arith.constant 0 : index
    %c0_14 = arith.constant 0 : index
    %28 = vector.load %arg1[%c6, %c0_13, %c0_14] : memref<9x1x512xf32, #tpu.memory_space<vmem>>, vector<1x1x512xf32>
    %29 = vector.shape_cast %28 : vector<1x1x512xf32> to vector<1x512xf32>
    %30 = vector.broadcast %29 : vector<1x512xf32> to vector<8x512xf32>
    %31 = arith.mulf %27, %30 : vector<8x512xf32>
    %c496_i32 = arith.constant 496 : i32
    %32 = tpu.dynamic_rotate %1 by %c496_i32 dim 1 : vector<8x512xf32>, i32 -> vector<8x512xf32>
    %c7 = arith.constant 7 : index
    %c0_15 = arith.constant 0 : index
    %c0_16 = arith.constant 0 : index
    %33 = vector.load %arg1[%c7, %c0_15, %c0_16] : memref<9x1x512xf32, #tpu.memory_space<vmem>>, vector<1x1x512xf32>
    %34 = vector.shape_cast %33 : vector<1x1x512xf32> to vector<1x512xf32>
    %35 = vector.broadcast %34 : vector<1x512xf32> to vector<8x512xf32>
    %36 = arith.mulf %32, %35 : vector<8x512xf32>
    %c495_i32 = arith.constant 495 : i32
    %37 = tpu.dynamic_rotate %1 by %c495_i32 dim 1 : vector<8x512xf32>, i32 -> vector<8x512xf32>
    %c8 = arith.constant 8 : index
    %c0_17 = arith.constant 0 : index
    %c0_18 = arith.constant 0 : index
    %38 = vector.load %arg1[%c8, %c0_17, %c0_18] : memref<9x1x512xf32, #tpu.memory_space<vmem>>, vector<1x1x512xf32>
    %39 = vector.shape_cast %38 : vector<1x1x512xf32> to vector<1x512xf32>
    %40 = vector.broadcast %39 : vector<1x512xf32> to vector<8x512xf32>
    %41 = arith.mulf %37, %40 : vector<8x512xf32>
    %42 = tpu.concatenate %6, %11, %16, %21, %1, %26, %31, %36, %41 in 0 : vector<8x512xf32>, vector<8x512xf32>, vector<8x512xf32>, vector<8x512xf32>, vector<8x512xf32>, vector<8x512xf32>, vector<8x512xf32>, vector<8x512xf32>, vector<8x512xf32> -> vector<72x512xf32>
    %c0_19 = arith.constant 0 : index
    %c0_20 = arith.constant 0 : index
    %43 = vector.load %arg3[%c0_19, %c0_20] : memref<8x72xf32, #tpu.memory_space<vmem>>, vector<8x72xf32>
    %cst = arith.constant dense<0.000000e+00> : vector<8x512xf32>
    %44 = tpu.matmul %43, %42, %cst {dimension_numbers = #tpu.dot_dimension_numbers<[1], [0], [0], [1], [0, 0, 1, 1], [], []>} : vector<8x72xf32>, vector<72x512xf32>, vector<8x512xf32> -> vector<8x512xf32>
    %c0_21 = arith.constant 0 : index
    %c0_22 = arith.constant 0 : index
    %45 = vector.load %arg4[%c0_21, %c0_22] : memref<8x1xf32, #tpu.memory_space<vmem>>, vector<8x1xf32>
    %46 = vector.broadcast %45 : vector<8x1xf32> to vector<8x512xf32>
    %47 = arith.addf %44, %46 : vector<8x512xf32>
    %c17_i32_23 = arith.constant 17 : i32
    %48 = tpu.dynamic_rotate %47 by %c17_i32_23 dim 1 : vector<8x512xf32>, i32 -> vector<8x512xf32>
    %c0_24 = arith.constant 0 : index
    %c0_25 = arith.constant 0 : index
    %c0_26 = arith.constant 0 : index
    %49 = vector.load %arg1[%c0_24, %c0_25, %c0_26] : memref<9x1x512xf32, #tpu.memory_space<vmem>>, vector<1x1x512xf32>
    %50 = vector.shape_cast %49 : vector<1x1x512xf32> to vector<1x512xf32>
    %51 = vector.broadcast %50 : vector<1x512xf32> to vector<8x512xf32>
    %52 = arith.mulf %48, %51 : vector<8x512xf32>
    %c16_i32_27 = arith.constant 16 : i32
    %53 = tpu.dynamic_rotate %47 by %c16_i32_27 dim 1 : vector<8x512xf32>, i32 -> vector<8x512xf32>
    %c1_28 = arith.constant 1 : index
    %c0_29 = arith.constant 0 : index
    %c0_30 = arith.constant 0 : index
    %54 = vector.load %arg1[%c1_28, %c0_29, %c0_30] : memref<9x1x512xf32, #tpu.memory_space<vmem>>, vector<1x1x512xf32>
    %55 = vector.shape_cast %54 : vector<1x1x512xf32> to vector<1x512xf32>
    %56 = vector.broadcast %55 : vector<1x512xf32> to vector<8x512xf32>
    %57 = arith.mulf %53, %56 : vector<8x512xf32>
    %c15_i32_31 = arith.constant 15 : i32
    %58 = tpu.dynamic_rotate %47 by %c15_i32_31 dim 1 : vector<8x512xf32>, i32 -> vector<8x512xf32>
    %c2_32 = arith.constant 2 : index
    %c0_33 = arith.constant 0 : index
    %c0_34 = arith.constant 0 : index
    %59 = vector.load %arg1[%c2_32, %c0_33, %c0_34] : memref<9x1x512xf32, #tpu.memory_space<vmem>>, vector<1x1x512xf32>
    %60 = vector.shape_cast %59 : vector<1x1x512xf32> to vector<1x512xf32>
    %61 = vector.broadcast %60 : vector<1x512xf32> to vector<8x512xf32>
    %62 = arith.mulf %58, %61 : vector<8x512xf32>
    %c1_i32_35 = arith.constant 1 : i32
    %63 = tpu.dynamic_rotate %47 by %c1_i32_35 dim 1 : vector<8x512xf32>, i32 -> vector<8x512xf32>
    %c3_36 = arith.constant 3 : index
    %c0_37 = arith.constant 0 : index
    %c0_38 = arith.constant 0 : index
    %64 = vector.load %arg1[%c3_36, %c0_37, %c0_38] : memref<9x1x512xf32, #tpu.memory_space<vmem>>, vector<1x1x512xf32>
    %65 = vector.shape_cast %64 : vector<1x1x512xf32> to vector<1x512xf32>
    %66 = vector.broadcast %65 : vector<1x512xf32> to vector<8x512xf32>
    %67 = arith.mulf %63, %66 : vector<8x512xf32>
    %c511_i32_39 = arith.constant 511 : i32
    %68 = tpu.dynamic_rotate %47 by %c511_i32_39 dim 1 : vector<8x512xf32>, i32 -> vector<8x512xf32>
    %c5_40 = arith.constant 5 : index
    %c0_41 = arith.constant 0 : index
    %c0_42 = arith.constant 0 : index
    %69 = vector.load %arg1[%c5_40, %c0_41, %c0_42] : memref<9x1x512xf32, #tpu.memory_space<vmem>>, vector<1x1x512xf32>
    %70 = vector.shape_cast %69 : vector<1x1x512xf32> to vector<1x512xf32>
    %71 = vector.broadcast %70 : vector<1x512xf32> to vector<8x512xf32>
    %72 = arith.mulf %68, %71 : vector<8x512xf32>
    %c497_i32_43 = arith.constant 497 : i32
    %73 = tpu.dynamic_rotate %47 by %c497_i32_43 dim 1 : vector<8x512xf32>, i32 -> vector<8x512xf32>
    %c6_44 = arith.constant 6 : index
    %c0_45 = arith.constant 0 : index
    %c0_46 = arith.constant 0 : index
    %74 = vector.load %arg1[%c6_44, %c0_45, %c0_46] : memref<9x1x512xf32, #tpu.memory_space<vmem>>, vector<1x1x512xf32>
    %75 = vector.shape_cast %74 : vector<1x1x512xf32> to vector<1x512xf32>
    %76 = vector.broadcast %75 : vector<1x512xf32> to vector<8x512xf32>
    %77 = arith.mulf %73, %76 : vector<8x512xf32>
    %c496_i32_47 = arith.constant 496 : i32
    %78 = tpu.dynamic_rotate %47 by %c496_i32_47 dim 1 : vector<8x512xf32>, i32 -> vector<8x512xf32>
    %c7_48 = arith.constant 7 : index
    %c0_49 = arith.constant 0 : index
    %c0_50 = arith.constant 0 : index
    %79 = vector.load %arg1[%c7_48, %c0_49, %c0_50] : memref<9x1x512xf32, #tpu.memory_space<vmem>>, vector<1x1x512xf32>
    %80 = vector.shape_cast %79 : vector<1x1x512xf32> to vector<1x512xf32>
    %81 = vector.broadcast %80 : vector<1x512xf32> to vector<8x512xf32>
    %82 = arith.mulf %78, %81 : vector<8x512xf32>
    %c495_i32_51 = arith.constant 495 : i32
    %83 = tpu.dynamic_rotate %47 by %c495_i32_51 dim 1 : vector<8x512xf32>, i32 -> vector<8x512xf32>
    %c8_52 = arith.constant 8 : index
    %c0_53 = arith.constant 0 : index
    %c0_54 = arith.constant 0 : index
    %84 = vector.load %arg1[%c8_52, %c0_53, %c0_54] : memref<9x1x512xf32, #tpu.memory_space<vmem>>, vector<1x1x512xf32>
    %85 = vector.shape_cast %84 : vector<1x1x512xf32> to vector<1x512xf32>
    %86 = vector.broadcast %85 : vector<1x512xf32> to vector<8x512xf32>
    %87 = arith.mulf %83, %86 : vector<8x512xf32>
    %88 = tpu.concatenate %52, %57, %62, %67, %47, %72, %77, %82, %87 in 0 : vector<8x512xf32>, vector<8x512xf32>, vector<8x512xf32>, vector<8x512xf32>, vector<8x512xf32>, vector<8x512xf32>, vector<8x512xf32>, vector<8x512xf32>, vector<8x512xf32> -> vector<72x512xf32>
    %c0_55 = arith.constant 0 : index
    %c0_56 = arith.constant 0 : index
    %89 = vector.load %arg5[%c0_55, %c0_56] : memref<4x72xf32, #tpu.memory_space<vmem>>, vector<4x72xf32>
    %cst_57 = arith.constant dense<0.000000e+00> : vector<4x512xf32>
    %90 = tpu.matmul %89, %88, %cst_57 {dimension_numbers = #tpu.dot_dimension_numbers<[1], [0], [0], [1], [0, 0, 1, 1], [], []>} : vector<4x72xf32>, vector<72x512xf32>, vector<4x512xf32> -> vector<4x512xf32>
    %c0_58 = arith.constant 0 : index
    %c0_59 = arith.constant 0 : index
    %91 = vector.load %arg6[%c0_58, %c0_59] : memref<4x1xf32, #tpu.memory_space<vmem>>, vector<4x1xf32>
    %92 = vector.broadcast %91 : vector<4x1xf32> to vector<4x512xf32>
    %93 = arith.addf %90, %92 : vector<4x512xf32>
    %94 = vector.extract_strided_slice %1 {offsets = [0, 0], sizes = [4, 512], strides = [1, 1]} : vector<8x512xf32> to vector<4x512xf32>
    %95 = arith.addf %93, %94 : vector<4x512xf32>
    %c0_60 = arith.constant 0 : index
    %c0_61 = arith.constant 0 : index
    %c0_62 = arith.constant 0 : index
    %96 = vector.load %arg7[%c0_60, %c0_61, %c0_62] : memref<1x4x512xf32, #tpu.memory_space<vmem>>, vector<1x4x512xf32>
    %97 = vector.shape_cast %96 : vector<1x4x512xf32> to vector<4x512xf32>
    %98 = vector.shape_cast %95 : vector<4x512xf32> to vector<1x4x512xf32>
    tpu.vector_store %arg7[%c0_60, %c0_61, %c0_62], %98 {strides = array<i32>} : memref<1x4x512xf32, #tpu.memory_space<vmem>>, vector<1x4x512xf32>,
    return
  }
  func.func @transform_0(%arg0: i32) -> (i32, i32, i32) {
    %c0_i32 = arith.constant 0 : i32
    %c0_i32_0 = arith.constant 0 : i32
    %c0_i32_1 = arith.constant 0 : i32
    %c0_i32_2 = arith.constant 0 : i32
    return %c0_i32, %c0_i32_0, %c0_i32_1 : i32, i32, i32
  }
  func.func @transform_1(%arg0: i32) -> (i32, i32, i32) {
    %c0_i32 = arith.constant 0 : i32
    %c0_i32_0 = arith.constant 0 : i32
    %c0_i32_1 = arith.constant 0 : i32
    return %arg0, %c0_i32, %c0_i32_0 : i32, i32, i32
  }
  func.func @transform_2(%arg0: i32) -> (i32, i32) {
    %c0_i32 = arith.constant 0 : i32
    %c0_i32_0 = arith.constant 0 : i32
    %c0_i32_1 = arith.constant 0 : i32
    return %c0_i32, %c0_i32_0 : i32, i32
  }
  func.func @transform_3(%arg0: i32) -> (i32, i32) {
    %c0_i32 = arith.constant 0 : i32
    %c0_i32_0 = arith.constant 0 : i32
    %c0_i32_1 = arith.constant 0 : i32
    return %c0_i32, %c0_i32_0 : i32, i32
  }
  func.func @transform_4(%arg0: i32) -> (i32, i32) {
    %c0_i32 = arith.constant 0 : i32
    %c0_i32_0 = arith.constant 0 : i32
    %c0_i32_1 = arith.constant 0 : i32
    return %c0_i32, %c0_i32_0 : i32, i32
  }
  func.func @transform_5(%arg0: i32) -> (i32, i32) {
    %c0_i32 = arith.constant 0 : i32
    %c0_i32_0 = arith.constant 0 : i32
    %c0_i32_1 = arith.constant 0 : i32
    return %c0_i32, %c0_i32_0 : i32, i32
  }
  func.func @transform_6(%arg0: i32) -> (i32, i32, i32) {
    %c0_i32 = arith.constant 0 : i32
    %c0_i32_0 = arith.constant 0 : i32
    %c0_i32_1 = arith.constant 0 : i32
    return %arg0, %c0_i32, %c0_i32_0 : i32, i32, i32
  }
}

module attributes {stable_mosaic.version = 11 : i64} {
  func.func @kernel(%arg0: i32, %arg1: memref<9x1x512xf32, #tpu.memory_space<vmem>>, %arg2: memref<1x8x512xf32, #tpu.memory_space<vmem>>, %arg3: memref<8x72xf32, #tpu.memory_space<vmem>>, %arg4: memref<8x1xf32, #tpu.memory_space<vmem>>, %arg5: memref<4x72xf32, #tpu.memory_space<vmem>>, %arg6: memref<4x1xf32, #tpu.memory_space<vmem>>, %arg7: memref<1x4x512xf32, #tpu.memory_space<vmem>>) attributes {dimension_semantics = [#tpu.dimension_semantics<parallel>], iteration_bounds = array<i64: 1>, scalar_prefetch = 0 : i64, scratch_operands = 0 : i64, tpu.core_type = #tpu.core_type<tc>, window_params = [{pipeline_mode = #tpu.pipeline_mode<synchronous>, transform_indices = @transform_0, window_bounds = array<i64: 9, 1, 512>}, {transform_indices = @transform_1, window_bounds = array<i64: 1, 8, 512>}, {pipeline_mode = #tpu.pipeline_mode<synchronous>, transform_indices = @transform_2, window_bounds = array<i64: 8, 72>}, {pipeline_mode = #tpu.pipeline_mode<synchronous>, transform_indices = @transform_3, window_bounds = array<i64: 8, 1>}, {pipeline_mode = #tpu.pipeline_mode<synchronous>, transform_indices = @transform_4, window_bounds = array<i64: 4, 72>}, {pipeline_mode = #tpu.pipeline_mode<synchronous>, transform_indices = @transform_5, window_bounds = array<i64: 4, 1>}, {transform_indices = @transform_6, window_bounds = array<i64: 1, 4, 512>}]} {
    %c0 = arith.constant 0 : index
    %c0_0 = arith.constant 0 : index
    %c0_1 = arith.constant 0 : index
    %0 = vector.load %arg2[%c0, %c0_0, %c0_1] : memref<1x8x512xf32, #tpu.memory_space<vmem>>, vector<1x8x512xf32>
    %1 = vector.shape_cast %0 : vector<1x8x512xf32> to vector<8x512xf32>
    %c17_i32 = arith.constant 17 : i32
    %2 = tpu.dynamic_rotate %1 by %c17_i32 dim 1 : vector<8x512xf32>, i32 -> vector<8x512xf32>
    %c0_2 = arith.constant 0 : index
    %c0_3 = arith.constant 0 : index
    %c0_4 = arith.constant 0 : index
    %3 = vector.load %arg1[%c0_2, %c0_3, %c0_4] : memref<9x1x512xf32, #tpu.memory_space<vmem>>, vector<1x1x512xf32>
    %4 = vector.shape_cast %3 : vector<1x1x512xf32> to vector<1x512xf32>
    %5 = vector.broadcast %4 : vector<1x512xf32> to vector<8x512xf32>
    %6 = arith.mulf %2, %5 : vector<8x512xf32>
    %c16_i32 = arith.constant 16 : i32
    %7 = tpu.dynamic_rotate %1 by %c16_i32 dim 1 : vector<8x512xf32>, i32 -> vector<8x512xf32>
    %c1 = arith.constant 1 : index
    %c0_5 = arith.constant 0 : index
    %c0_6 = arith.constant 0 : index
    %8 = vector.load %arg1[%c1, %c0_5, %c0_6] : memref<9x1x512xf32, #tpu.memory_space<vmem>>, vector<1x1x512xf32>
    %9 = vector.shape_cast %8 : vector<1x1x512xf32> to vector<1x512xf32>
    %10 = vector.broadcast %9 : vector<1x512xf32> to vector<8x512xf32>
    %11 = arith.mulf %7, %10 : vector<8x512xf32>
    %c15_i32 = arith.constant 15 : i32
    %12 = tpu.dynamic_rotate %1 by %c15_i32 dim 1 : vector<8x512xf32>, i32 -> vector<8x512xf32>
    %c2 = arith.constant 2 : index
    %c0_7 = arith.constant 0 : index
    %c0_8 = arith.constant 0 : index
    %13 = vector.load %arg1[%c2, %c0_7, %c0_8] : memref<9x1x512xf32, #tpu.memory_space<vmem>>, vector<1x1x512xf32>
    %14 = vector.shape_cast %13 : vector<1x1x512xf32> to vector<1x512xf32>
    %15 = vector.broadcast %14 : vector<1x512xf32> to vector<8x512xf32>
    %16 = arith.mulf %12, %15 : vector<8x512xf32>
    %c1_i32 = arith.constant 1 : i32
    %17 = tpu.dynamic_rotate %1 by %c1_i32 dim 1 : vector<8x512xf32>, i32 -> vector<8x512xf32>
    %c3 = arith.constant 3 : index
    %c0_9 = arith.constant 0 : index
    %c0_10 = arith.constant 0 : index
    %18 = vector.load %arg1[%c3, %c0_9, %c0_10] : memref<9x1x512xf32, #tpu.memory_space<vmem>>, vector<1x1x512xf32>
    %19 = vector.shape_cast %18 : vector<1x1x512xf32> to vector<1x512xf32>
    %20 = vector.broadcast %19 : vector<1x512xf32> to vector<8x512xf32>
    %21 = arith.mulf %17, %20 : vector<8x512xf32>
    %c511_i32 = arith.constant 511 : i32
    %22 = tpu.dynamic_rotate %1 by %c511_i32 dim 1 : vector<8x512xf32>, i32 -> vector<8x512xf32>
    %c5 = arith.constant 5 : index
    %c0_11 = arith.constant 0 : index
    %c0_12 = arith.constant 0 : index
    %23 = vector.load %arg1[%c5, %c0_11, %c0_12] : memref<9x1x512xf32, #tpu.memory_space<vmem>>, vector<1x1x512xf32>
    %24 = vector.shape_cast %23 : vector<1x1x512xf32> to vector<1x512xf32>
    %25 = vector.broadcast %24 : vector<1x512xf32> to vector<8x512xf32>
    %26 = arith.mulf %22, %25 : vector<8x512xf32>
    %c497_i32 = arith.constant 497 : i32
    %27 = tpu.dynamic_rotate %1 by %c497_i32 dim 1 : vector<8x512xf32>, i32 -> vector<8x512xf32>
    %c6 = arith.constant 6 : index
    %c0_13 = arith.constant 0 : index
    %c0_14 = arith.constant 0 : index
    %28 = vector.load %arg1[%c6, %c0_13, %c0_14] : memref<9x1x512xf32, #tpu.memory_space<vmem>>, vector<1x1x512xf32>
    %29 = vector.shape_cast %28 : vector<1x1x512xf32> to vector<1x512xf32>
    %30 = vector.broadcast %29 : vector<1x512xf32> to vector<8x512xf32>
    %31 = arith.mulf %27, %30 : vector<8x512xf32>
    %c496_i32 = arith.constant 496 : i32
    %32 = tpu.dynamic_rotate %1 by %c496_i32 dim 1 : vector<8x512xf32>, i32 -> vector<8x512xf32>
    %c7 = arith.constant 7 : index
    %c0_15 = arith.constant 0 : index
    %c0_16 = arith.constant 0 : index
    %33 = vector.load %arg1[%c7, %c0_15, %c0_16] : memref<9x1x512xf32, #tpu.memory_space<vmem>>, vector<1x1x512xf32>
    %34 = vector.shape_cast %33 : vector<1x1x512xf32> to vector<1x512xf32>
    %35 = vector.broadcast %34 : vector<1x512xf32> to vector<8x512xf32>
    %36 = arith.mulf %32, %35 : vector<8x512xf32>
    %c495_i32 = arith.constant 495 : i32
    %37 = tpu.dynamic_rotate %1 by %c495_i32 dim 1 : vector<8x512xf32>, i32 -> vector<8x512xf32>
    %c8 = arith.constant 8 : index
    %c0_17 = arith.constant 0 : index
    %c0_18 = arith.constant 0 : index
    %38 = vector.load %arg1[%c8, %c0_17, %c0_18] : memref<9x1x512xf32, #tpu.memory_space<vmem>>, vector<1x1x512xf32>
    %39 = vector.shape_cast %38 : vector<1x1x512xf32> to vector<1x512xf32>
    %40 = vector.broadcast %39 : vector<1x512xf32> to vector<8x512xf32>
    %41 = arith.mulf %37, %40 : vector<8x512xf32>
    %42 = tpu.concatenate %6, %11, %16, %21, %1, %26, %31, %36, %41 in 0 : vector<8x512xf32>, vector<8x512xf32>, vector<8x512xf32>, vector<8x512xf32>, vector<8x512xf32>, vector<8x512xf32>, vector<8x512xf32>, vector<8x512xf32>, vector<8x512xf32> -> vector<72x512xf32>
    %c0_19 = arith.constant 0 : index
    %c0_20 = arith.constant 0 : index
    %43 = vector.load %arg3[%c0_19, %c0_20] : memref<8x72xf32, #tpu.memory_space<vmem>>, vector<8x72xf32>
    %cst = arith.constant dense<0.000000e+00> : vector<8x512xf32>
    %44 = tpu.matmul %43, %42, %cst {dimension_numbers = #tpu.dot_dimension_numbers<[1], [0], [0], [1], [0, 0, 1, 1], [], []>} : vector<8x72xf32>, vector<72x512xf32>, vector<8x512xf32> -> vector<8x512xf32>
    %c0_21 = arith.constant 0 : index
    %c0_22 = arith.constant 0 : index
    %45 = vector.load %arg4[%c0_21, %c0_22] : memref<8x1xf32, #tpu.memory_space<vmem>>, vector<8x1xf32>
    %46 = vector.broadcast %45 : vector<8x1xf32> to vector<8x512xf32>
    %47 = arith.addf %44, %46 : vector<8x512xf32>
    %c17_i32_23 = arith.constant 17 : i32
    %48 = tpu.dynamic_rotate %47 by %c17_i32_23 dim 1 : vector<8x512xf32>, i32 -> vector<8x512xf32>
    %c0_24 = arith.constant 0 : index
    %c0_25 = arith.constant 0 : index
    %c0_26 = arith.constant 0 : index
    %49 = vector.load %arg1[%c0_24, %c0_25, %c0_26] : memref<9x1x512xf32, #tpu.memory_space<vmem>>, vector<1x1x512xf32>
    %50 = vector.shape_cast %49 : vector<1x1x512xf32> to vector<1x512xf32>
    %51 = vector.broadcast %50 : vector<1x512xf32> to vector<8x512xf32>
    %52 = arith.mulf %48, %51 : vector<8x512xf32>
    %c16_i32_27 = arith.constant 16 : i32
    %53 = tpu.dynamic_rotate %47 by %c16_i32_27 dim 1 : vector<8x512xf32>, i32 -> vector<8x512xf32>
    %c1_28 = arith.constant 1 : index
    %c0_29 = arith.constant 0 : index
    %c0_30 = arith.constant 0 : index
    %54 = vector.load %arg1[%c1_28, %c0_29, %c0_30] : memref<9x1x512xf32, #tpu.memory_space<vmem>>, vector<1x1x512xf32>
    %55 = vector.shape_cast %54 : vector<1x1x512xf32> to vector<1x512xf32>
    %56 = vector.broadcast %55 : vector<1x512xf32> to vector<8x512xf32>
    %57 = arith.mulf %53, %56 : vector<8x512xf32>
    %c15_i32_31 = arith.constant 15 : i32
    %58 = tpu.dynamic_rotate %47 by %c15_i32_31 dim 1 : vector<8x512xf32>, i32 -> vector<8x512xf32>
    %c2_32 = arith.constant 2 : index
    %c0_33 = arith.constant 0 : index
    %c0_34 = arith.constant 0 : index
    %59 = vector.load %arg1[%c2_32, %c0_33, %c0_34] : memref<9x1x512xf32, #tpu.memory_space<vmem>>, vector<1x1x512xf32>
    %60 = vector.shape_cast %59 : vector<1x1x512xf32> to vector<1x512xf32>
    %61 = vector.broadcast %60 : vector<1x512xf32> to vector<8x512xf32>
    %62 = arith.mulf %58, %61 : vector<8x512xf32>
    %c1_i32_35 = arith.constant 1 : i32
    %63 = tpu.dynamic_rotate %47 by %c1_i32_35 dim 1 : vector<8x512xf32>, i32 -> vector<8x512xf32>
    %c3_36 = arith.constant 3 : index
    %c0_37 = arith.constant 0 : index
    %c0_38 = arith.constant 0 : index
    %64 = vector.load %arg1[%c3_36, %c0_37, %c0_38] : memref<9x1x512xf32, #tpu.memory_space<vmem>>, vector<1x1x512xf32>
    %65 = vector.shape_cast %64 : vector<1x1x512xf32> to vector<1x512xf32>
    %66 = vector.broadcast %65 : vector<1x512xf32> to vector<8x512xf32>
    %67 = arith.mulf %63, %66 : vector<8x512xf32>
    %c511_i32_39 = arith.constant 511 : i32
    %68 = tpu.dynamic_rotate %47 by %c511_i32_39 dim 1 : vector<8x512xf32>, i32 -> vector<8x512xf32>
    %c5_40 = arith.constant 5 : index
    %c0_41 = arith.constant 0 : index
    %c0_42 = arith.constant 0 : index
    %69 = vector.load %arg1[%c5_40, %c0_41, %c0_42] : memref<9x1x512xf32, #tpu.memory_space<vmem>>, vector<1x1x512xf32>
    %70 = vector.shape_cast %69 : vector<1x1x512xf32> to vector<1x512xf32>
    %71 = vector.broadcast %70 : vector<1x512xf32> to vector<8x512xf32>
    %72 = arith.mulf %68, %71 : vector<8x512xf32>
    %c497_i32_43 = arith.constant 497 : i32
    %73 = tpu.dynamic_rotate %47 by %c497_i32_43 dim 1 : vector<8x512xf32>, i32 -> vector<8x512xf32>
    %c6_44 = arith.constant 6 : index
    %c0_45 = arith.constant 0 : index
    %c0_46 = arith.constant 0 : index
    %74 = vector.load %arg1[%c6_44, %c0_45, %c0_46] : memref<9x1x512xf32, #tpu.memory_space<vmem>>, vector<1x1x512xf32>
    %75 = vector.shape_cast %74 : vector<1x1x512xf32> to vector<1x512xf32>
    %76 = vector.broadcast %75 : vector<1x512xf32> to vector<8x512xf32>
    %77 = arith.mulf %73, %76 : vector<8x512xf32>
    %c496_i32_47 = arith.constant 496 : i32
    %78 = tpu.dynamic_rotate %47 by %c496_i32_47 dim 1 : vector<8x512xf32>, i32 -> vector<8x512xf32>
    %c7_48 = arith.constant 7 : index
    %c0_49 = arith.constant 0 : index
    %c0_50 = arith.constant 0 : index
    %79 = vector.load %arg1[%c7_48, %c0_49, %c0_50] : memref<9x1x512xf32, #tpu.memory_space<vmem>>, vector<1x1x512xf32>
    %80 = vector.shape_cast %79 : vector<1x1x512xf32> to vector<1x512xf32>
    %81 = vector.broadcast %80 : vector<1x512xf32> to vector<8x512xf32>
    %82 = arith.mulf %78, %81 : vector<8x512xf32>
    %c495_i32_51 = arith.constant 495 : i32
    %83 = tpu.dynamic_rotate %47 by %c495_i32_51 dim 1 : vector<8x512xf32>, i32 -> vector<8x512xf32>
    %c8_52 = arith.constant 8 : index
    %c0_53 = arith.constant 0 : index
    %c0_54 = arith.constant 0 : index
    %84 = vector.load %arg1[%c8_52, %c0_53, %c0_54] : memref<9x1x512xf32, #tpu.memory_space<vmem>>, vector<1x1x512xf32>
    %85 = vector.shape_cast %84 : vector<1x1x512xf32> to vector<1x512xf32>
    %86 = vector.broadcast %85 : vector<1x512xf32> to vector<8x512xf32>
    %87 = arith.mulf %83, %86 : vector<8x512xf32>
    %88 = tpu.concatenate %52, %57, %62, %67, %47, %72, %77, %82, %87 in 0 : vector<8x512xf32>, vector<8x512xf32>, vector<8x512xf32>, vector<8x512xf32>, vector<8x512xf32>, vector<8x512xf32>, vector<8x512xf32>, vector<8x512xf32>, vector<8x512xf32> -> vector<72x512xf32>
    %c0_55 = arith.constant 0 : index
    %c0_56 = arith.constant 0 : index
    %89 = vector.load %arg5[%c0_55, %c0_56] : memref<4x72xf32, #tpu.memory_space<vmem>>, vector<4x72xf32>
    %cst_57 = arith.constant dense<0.000000e+00> : vector<4x512xf32>
    %90 = tpu.matmul %89, %88, %cst_57 {dimension_numbers = #tpu.dot_dimension_numbers<[1], [0], [0], [1], [0, 0, 1, 1], [], []>} : vector<4x72xf32>, vector<72x512xf32>, vector<4x512xf32> -> vector<4x512xf32>
    %c0_58 = arith.constant 0 : index
    %c0_59 = arith.constant 0 : index
    %91 = vector.load %arg6[%c0_58, %c0_59] : memref<4x1xf32, #tpu.memory_space<vmem>>, vector<4x1xf32>
    %92 = vector.broadcast %91 : vector<4x1xf32> to vector<4x512xf32>
    %93 = arith.addf %90, %92 : vector<4x512xf32>
    %94 = vector.extract_strided_slice %1 {offsets = [0, 0], sizes = [4, 512], strides = [1, 1]} : vector<8x512xf32> to vector<4x512xf32>
    %95 = arith.addf %93, %94 : vector<4x512xf32>
    %c0_60 = arith.constant 0 : index
    %c0_61 = arith.constant 0 : index
    %c0_62 = arith.constant 0 : index
    %96 = vector.load %arg7[%c0_60, %c0_61, %c0_62] : memref<1x4x512xf32, #tpu.memory_space<vmem>>, vector<1x4x512xf32>
    %97 = vector.shape_cast %96 : vector<1x4x512xf32> to vector<4x512xf32>
    %98 = vector.shape_cast %95 : vector<4x512xf32> to vector<1x4x512xf32>
    tpu.vector_store %arg7[%c0_60, %c0_61, %c0_62], %98 {strides = array<i32>} : memref<1x4x512xf32, #tpu.memory_space<vmem>>, vector<1x4x512xf32>,
    return
  }
  func.func @transform_0(%arg0: i32) -> (i32, i32, i32) {
    %c0_i32 = arith.constant 0 : i32
    %c0_i32_0 = arith.constant 0 : i32
    %c0_i32_1 = arith.constant 0 : i32
    %c0_i32_2 = arith.constant 0 : i32
    return %c0_i32, %c0_i32_0, %c0_i32_1 : i32, i32, i32
  }
  func.func @transform_1(%arg0: i32) -> (i32, i32, i32) {
    %c0_i32 = arith.constant 0 : i32
    %c0_i32_0 = arith.constant 0 : i32
    %c0_i32_1 = arith.constant 0 : i32
    return %arg0, %c0_i32, %c0_i32_0 : i32, i32, i32
  }
  func.func @transform_2(%arg0: i32) -> (i32, i32) {
    %c0_i32 = arith.constant 0 : i32
    %c0_i32_0 = arith.constant 0 : i32
    %c0_i32_1 = arith.constant 0 : i32
    return %c0_i32, %c0_i32_0 : i32, i32
  }
  func.func @transform_3(%arg0: i32) -> (i32, i32) {
    %c0_i32 = arith.constant 0 : i32
    %c0_i32_0 = arith.constant 0 : i32
    %c0_i32_1 = arith.constant 0 : i32
    return %c0_i32, %c0_i32_0 : i32, i32
  }
  func.func @transform_4(%arg0: i32) -> (i32, i32) {
    %c0_i32 = arith.constant 0 : i32
    %c0_i32_0 = arith.constant 0 : i32
    %c0_i32_1 = arith.constant 0 : i32
    return %c0_i32, %c0_i32_0 : i32, i32
  }
  func.func @transform_5(%arg0: i32) -> (i32, i32) {
    %c0_i32 = arith.constant 0 : i32
    %c0_i32_0 = arith.constant 0 : i32
    %c0_i32_1 = arith.constant 0 : i32
    return %c0_i32, %c0_i32_0 : i32, i32
  }
  func.func @transform_6(%arg0: i32) -> (i32, i32, i32) {
    %c0_i32 = arith.constant 0 : i32
    %c0_i32_0 = arith.constant 0 : i32
    %c0_i32_1 = arith.constant 0 : i32
    return %arg0, %c0_i32, %c0_i32_0 : i32, i32, i32
  }
}

module attributes {stable_mosaic.version = 11 : i64} {
  func.func @kernel(%arg0: i32, %arg1: memref<9x1x512xf32, #tpu.memory_space<vmem>>, %arg2: memref<1x8x512xf32, #tpu.memory_space<vmem>>, %arg3: memref<8x72xf32, #tpu.memory_space<vmem>>, %arg4: memref<8x1xf32, #tpu.memory_space<vmem>>, %arg5: memref<4x72xf32, #tpu.memory_space<vmem>>, %arg6: memref<4x1xf32, #tpu.memory_space<vmem>>, %arg7: memref<1x4x512xf32, #tpu.memory_space<vmem>>) attributes {dimension_semantics = [#tpu.dimension_semantics<parallel>], iteration_bounds = array<i64: 1>, scalar_prefetch = 0 : i64, scratch_operands = 0 : i64, tpu.core_type = #tpu.core_type<tc>, window_params = [{pipeline_mode = #tpu.pipeline_mode<synchronous>, transform_indices = @transform_0, window_bounds = array<i64: 9, 1, 512>}, {transform_indices = @transform_1, window_bounds = array<i64: 1, 8, 512>}, {pipeline_mode = #tpu.pipeline_mode<synchronous>, transform_indices = @transform_2, window_bounds = array<i64: 8, 72>}, {pipeline_mode = #tpu.pipeline_mode<synchronous>, transform_indices = @transform_3, window_bounds = array<i64: 8, 1>}, {pipeline_mode = #tpu.pipeline_mode<synchronous>, transform_indices = @transform_4, window_bounds = array<i64: 4, 72>}, {pipeline_mode = #tpu.pipeline_mode<synchronous>, transform_indices = @transform_5, window_bounds = array<i64: 4, 1>}, {transform_indices = @transform_6, window_bounds = array<i64: 1, 4, 512>}]} {
    %c0 = arith.constant 0 : index
    %c0_0 = arith.constant 0 : index
    %c0_1 = arith.constant 0 : index
    %0 = vector.load %arg2[%c0, %c0_0, %c0_1] : memref<1x8x512xf32, #tpu.memory_space<vmem>>, vector<1x8x512xf32>
    %1 = vector.shape_cast %0 : vector<1x8x512xf32> to vector<8x512xf32>
    %c17_i32 = arith.constant 17 : i32
    %2 = tpu.dynamic_rotate %1 by %c17_i32 dim 1 : vector<8x512xf32>, i32 -> vector<8x512xf32>
    %c0_2 = arith.constant 0 : index
    %c0_3 = arith.constant 0 : index
    %c0_4 = arith.constant 0 : index
    %3 = vector.load %arg1[%c0_2, %c0_3, %c0_4] : memref<9x1x512xf32, #tpu.memory_space<vmem>>, vector<1x1x512xf32>
    %4 = vector.shape_cast %3 : vector<1x1x512xf32> to vector<1x512xf32>
    %5 = vector.broadcast %4 : vector<1x512xf32> to vector<8x512xf32>
    %6 = arith.mulf %2, %5 : vector<8x512xf32>
    %c16_i32 = arith.constant 16 : i32
    %7 = tpu.dynamic_rotate %1 by %c16_i32 dim 1 : vector<8x512xf32>, i32 -> vector<8x512xf32>
    %c1 = arith.constant 1 : index
    %c0_5 = arith.constant 0 : index
    %c0_6 = arith.constant 0 : index
    %8 = vector.load %arg1[%c1, %c0_5, %c0_6] : memref<9x1x512xf32, #tpu.memory_space<vmem>>, vector<1x1x512xf32>
    %9 = vector.shape_cast %8 : vector<1x1x512xf32> to vector<1x512xf32>
    %10 = vector.broadcast %9 : vector<1x512xf32> to vector<8x512xf32>
    %11 = arith.mulf %7, %10 : vector<8x512xf32>
    %c15_i32 = arith.constant 15 : i32
    %12 = tpu.dynamic_rotate %1 by %c15_i32 dim 1 : vector<8x512xf32>, i32 -> vector<8x512xf32>
    %c2 = arith.constant 2 : index
    %c0_7 = arith.constant 0 : index
    %c0_8 = arith.constant 0 : index
    %13 = vector.load %arg1[%c2, %c0_7, %c0_8] : memref<9x1x512xf32, #tpu.memory_space<vmem>>, vector<1x1x512xf32>
    %14 = vector.shape_cast %13 : vector<1x1x512xf32> to vector<1x512xf32>
    %15 = vector.broadcast %14 : vector<1x512xf32> to vector<8x512xf32>
    %16 = arith.mulf %12, %15 : vector<8x512xf32>
    %c1_i32 = arith.constant 1 : i32
    %17 = tpu.dynamic_rotate %1 by %c1_i32 dim 1 : vector<8x512xf32>, i32 -> vector<8x512xf32>
    %c3 = arith.constant 3 : index
    %c0_9 = arith.constant 0 : index
    %c0_10 = arith.constant 0 : index
    %18 = vector.load %arg1[%c3, %c0_9, %c0_10] : memref<9x1x512xf32, #tpu.memory_space<vmem>>, vector<1x1x512xf32>
    %19 = vector.shape_cast %18 : vector<1x1x512xf32> to vector<1x512xf32>
    %20 = vector.broadcast %19 : vector<1x512xf32> to vector<8x512xf32>
    %21 = arith.mulf %17, %20 : vector<8x512xf32>
    %c511_i32 = arith.constant 511 : i32
    %22 = tpu.dynamic_rotate %1 by %c511_i32 dim 1 : vector<8x512xf32>, i32 -> vector<8x512xf32>
    %c5 = arith.constant 5 : index
    %c0_11 = arith.constant 0 : index
    %c0_12 = arith.constant 0 : index
    %23 = vector.load %arg1[%c5, %c0_11, %c0_12] : memref<9x1x512xf32, #tpu.memory_space<vmem>>, vector<1x1x512xf32>
    %24 = vector.shape_cast %23 : vector<1x1x512xf32> to vector<1x512xf32>
    %25 = vector.broadcast %24 : vector<1x512xf32> to vector<8x512xf32>
    %26 = arith.mulf %22, %25 : vector<8x512xf32>
    %c497_i32 = arith.constant 497 : i32
    %27 = tpu.dynamic_rotate %1 by %c497_i32 dim 1 : vector<8x512xf32>, i32 -> vector<8x512xf32>
    %c6 = arith.constant 6 : index
    %c0_13 = arith.constant 0 : index
    %c0_14 = arith.constant 0 : index
    %28 = vector.load %arg1[%c6, %c0_13, %c0_14] : memref<9x1x512xf32, #tpu.memory_space<vmem>>, vector<1x1x512xf32>
    %29 = vector.shape_cast %28 : vector<1x1x512xf32> to vector<1x512xf32>
    %30 = vector.broadcast %29 : vector<1x512xf32> to vector<8x512xf32>
    %31 = arith.mulf %27, %30 : vector<8x512xf32>
    %c496_i32 = arith.constant 496 : i32
    %32 = tpu.dynamic_rotate %1 by %c496_i32 dim 1 : vector<8x512xf32>, i32 -> vector<8x512xf32>
    %c7 = arith.constant 7 : index
    %c0_15 = arith.constant 0 : index
    %c0_16 = arith.constant 0 : index
    %33 = vector.load %arg1[%c7, %c0_15, %c0_16] : memref<9x1x512xf32, #tpu.memory_space<vmem>>, vector<1x1x512xf32>
    %34 = vector.shape_cast %33 : vector<1x1x512xf32> to vector<1x512xf32>
    %35 = vector.broadcast %34 : vector<1x512xf32> to vector<8x512xf32>
    %36 = arith.mulf %32, %35 : vector<8x512xf32>
    %c495_i32 = arith.constant 495 : i32
    %37 = tpu.dynamic_rotate %1 by %c495_i32 dim 1 : vector<8x512xf32>, i32 -> vector<8x512xf32>
    %c8 = arith.constant 8 : index
    %c0_17 = arith.constant 0 : index
    %c0_18 = arith.constant 0 : index
    %38 = vector.load %arg1[%c8, %c0_17, %c0_18] : memref<9x1x512xf32, #tpu.memory_space<vmem>>, vector<1x1x512xf32>
    %39 = vector.shape_cast %38 : vector<1x1x512xf32> to vector<1x512xf32>
    %40 = vector.broadcast %39 : vector<1x512xf32> to vector<8x512xf32>
    %41 = arith.mulf %37, %40 : vector<8x512xf32>
    %42 = tpu.concatenate %6, %11, %16, %21, %1, %26, %31, %36, %41 in 0 : vector<8x512xf32>, vector<8x512xf32>, vector<8x512xf32>, vector<8x512xf32>, vector<8x512xf32>, vector<8x512xf32>, vector<8x512xf32>, vector<8x512xf32>, vector<8x512xf32> -> vector<72x512xf32>
    %c0_19 = arith.constant 0 : index
    %c0_20 = arith.constant 0 : index
    %43 = vector.load %arg3[%c0_19, %c0_20] : memref<8x72xf32, #tpu.memory_space<vmem>>, vector<8x72xf32>
    %cst = arith.constant dense<0.000000e+00> : vector<8x512xf32>
    %44 = tpu.matmul %43, %42, %cst {dimension_numbers = #tpu.dot_dimension_numbers<[1], [0], [0], [1], [0, 0, 1, 1], [], []>} : vector<8x72xf32>, vector<72x512xf32>, vector<8x512xf32> -> vector<8x512xf32>
    %c0_21 = arith.constant 0 : index
    %c0_22 = arith.constant 0 : index
    %45 = vector.load %arg4[%c0_21, %c0_22] : memref<8x1xf32, #tpu.memory_space<vmem>>, vector<8x1xf32>
    %46 = vector.broadcast %45 : vector<8x1xf32> to vector<8x512xf32>
    %47 = arith.addf %44, %46 : vector<8x512xf32>
    %c17_i32_23 = arith.constant 17 : i32
    %48 = tpu.dynamic_rotate %47 by %c17_i32_23 dim 1 : vector<8x512xf32>, i32 -> vector<8x512xf32>
    %c0_24 = arith.constant 0 : index
    %c0_25 = arith.constant 0 : index
    %c0_26 = arith.constant 0 : index
    %49 = vector.load %arg1[%c0_24, %c0_25, %c0_26] : memref<9x1x512xf32, #tpu.memory_space<vmem>>, vector<1x1x512xf32>
    %50 = vector.shape_cast %49 : vector<1x1x512xf32> to vector<1x512xf32>
    %51 = vector.broadcast %50 : vector<1x512xf32> to vector<8x512xf32>
    %52 = arith.mulf %48, %51 : vector<8x512xf32>
    %c16_i32_27 = arith.constant 16 : i32
    %53 = tpu.dynamic_rotate %47 by %c16_i32_27 dim 1 : vector<8x512xf32>, i32 -> vector<8x512xf32>
    %c1_28 = arith.constant 1 : index
    %c0_29 = arith.constant 0 : index
    %c0_30 = arith.constant 0 : index
    %54 = vector.load %arg1[%c1_28, %c0_29, %c0_30] : memref<9x1x512xf32, #tpu.memory_space<vmem>>, vector<1x1x512xf32>
    %55 = vector.shape_cast %54 : vector<1x1x512xf32> to vector<1x512xf32>
    %56 = vector.broadcast %55 : vector<1x512xf32> to vector<8x512xf32>
    %57 = arith.mulf %53, %56 : vector<8x512xf32>
    %c15_i32_31 = arith.constant 15 : i32
    %58 = tpu.dynamic_rotate %47 by %c15_i32_31 dim 1 : vector<8x512xf32>, i32 -> vector<8x512xf32>
    %c2_32 = arith.constant 2 : index
    %c0_33 = arith.constant 0 : index
    %c0_34 = arith.constant 0 : index
    %59 = vector.load %arg1[%c2_32, %c0_33, %c0_34] : memref<9x1x512xf32, #tpu.memory_space<vmem>>, vector<1x1x512xf32>
    %60 = vector.shape_cast %59 : vector<1x1x512xf32> to vector<1x512xf32>
    %61 = vector.broadcast %60 : vector<1x512xf32> to vector<8x512xf32>
    %62 = arith.mulf %58, %61 : vector<8x512xf32>
    %c1_i32_35 = arith.constant 1 : i32
    %63 = tpu.dynamic_rotate %47 by %c1_i32_35 dim 1 : vector<8x512xf32>, i32 -> vector<8x512xf32>
    %c3_36 = arith.constant 3 : index
    %c0_37 = arith.constant 0 : index
    %c0_38 = arith.constant 0 : index
    %64 = vector.load %arg1[%c3_36, %c0_37, %c0_38] : memref<9x1x512xf32, #tpu.memory_space<vmem>>, vector<1x1x512xf32>
    %65 = vector.shape_cast %64 : vector<1x1x512xf32> to vector<1x512xf32>
    %66 = vector.broadcast %65 : vector<1x512xf32> to vector<8x512xf32>
    %67 = arith.mulf %63, %66 : vector<8x512xf32>
    %c511_i32_39 = arith.constant 511 : i32
    %68 = tpu.dynamic_rotate %47 by %c511_i32_39 dim 1 : vector<8x512xf32>, i32 -> vector<8x512xf32>
    %c5_40 = arith.constant 5 : index
    %c0_41 = arith.constant 0 : index
    %c0_42 = arith.constant 0 : index
    %69 = vector.load %arg1[%c5_40, %c0_41, %c0_42] : memref<9x1x512xf32, #tpu.memory_space<vmem>>, vector<1x1x512xf32>
    %70 = vector.shape_cast %69 : vector<1x1x512xf32> to vector<1x512xf32>
    %71 = vector.broadcast %70 : vector<1x512xf32> to vector<8x512xf32>
    %72 = arith.mulf %68, %71 : vector<8x512xf32>
    %c497_i32_43 = arith.constant 497 : i32
    %73 = tpu.dynamic_rotate %47 by %c497_i32_43 dim 1 : vector<8x512xf32>, i32 -> vector<8x512xf32>
    %c6_44 = arith.constant 6 : index
    %c0_45 = arith.constant 0 : index
    %c0_46 = arith.constant 0 : index
    %74 = vector.load %arg1[%c6_44, %c0_45, %c0_46] : memref<9x1x512xf32, #tpu.memory_space<vmem>>, vector<1x1x512xf32>
    %75 = vector.shape_cast %74 : vector<1x1x512xf32> to vector<1x512xf32>
    %76 = vector.broadcast %75 : vector<1x512xf32> to vector<8x512xf32>
    %77 = arith.mulf %73, %76 : vector<8x512xf32>
    %c496_i32_47 = arith.constant 496 : i32
    %78 = tpu.dynamic_rotate %47 by %c496_i32_47 dim 1 : vector<8x512xf32>, i32 -> vector<8x512xf32>
    %c7_48 = arith.constant 7 : index
    %c0_49 = arith.constant 0 : index
    %c0_50 = arith.constant 0 : index
    %79 = vector.load %arg1[%c7_48, %c0_49, %c0_50] : memref<9x1x512xf32, #tpu.memory_space<vmem>>, vector<1x1x512xf32>
    %80 = vector.shape_cast %79 : vector<1x1x512xf32> to vector<1x512xf32>
    %81 = vector.broadcast %80 : vector<1x512xf32> to vector<8x512xf32>
    %82 = arith.mulf %78, %81 : vector<8x512xf32>
    %c495_i32_51 = arith.constant 495 : i32
    %83 = tpu.dynamic_rotate %47 by %c495_i32_51 dim 1 : vector<8x512xf32>, i32 -> vector<8x512xf32>
    %c8_52 = arith.constant 8 : index
    %c0_53 = arith.constant 0 : index
    %c0_54 = arith.constant 0 : index
    %84 = vector.load %arg1[%c8_52, %c0_53, %c0_54] : memref<9x1x512xf32, #tpu.memory_space<vmem>>, vector<1x1x512xf32>
    %85 = vector.shape_cast %84 : vector<1x1x512xf32> to vector<1x512xf32>
    %86 = vector.broadcast %85 : vector<1x512xf32> to vector<8x512xf32>
    %87 = arith.mulf %83, %86 : vector<8x512xf32>
    %88 = tpu.concatenate %52, %57, %62, %67, %47, %72, %77, %82, %87 in 0 : vector<8x512xf32>, vector<8x512xf32>, vector<8x512xf32>, vector<8x512xf32>, vector<8x512xf32>, vector<8x512xf32>, vector<8x512xf32>, vector<8x512xf32>, vector<8x512xf32> -> vector<72x512xf32>
    %c0_55 = arith.constant 0 : index
    %c0_56 = arith.constant 0 : index
    %89 = vector.load %arg5[%c0_55, %c0_56] : memref<4x72xf32, #tpu.memory_space<vmem>>, vector<4x72xf32>
    %cst_57 = arith.constant dense<0.000000e+00> : vector<4x512xf32>
    %90 = tpu.matmul %89, %88, %cst_57 {dimension_numbers = #tpu.dot_dimension_numbers<[1], [0], [0], [1], [0, 0, 1, 1], [], []>} : vector<4x72xf32>, vector<72x512xf32>, vector<4x512xf32> -> vector<4x512xf32>
    %c0_58 = arith.constant 0 : index
    %c0_59 = arith.constant 0 : index
    %91 = vector.load %arg6[%c0_58, %c0_59] : memref<4x1xf32, #tpu.memory_space<vmem>>, vector<4x1xf32>
    %92 = vector.broadcast %91 : vector<4x1xf32> to vector<4x512xf32>
    %93 = arith.addf %90, %92 : vector<4x512xf32>
    %94 = vector.extract_strided_slice %1 {offsets = [0, 0], sizes = [4, 512], strides = [1, 1]} : vector<8x512xf32> to vector<4x512xf32>
    %95 = arith.addf %93, %94 : vector<4x512xf32>
    %c0_60 = arith.constant 0 : index
    %c0_61 = arith.constant 0 : index
    %c0_62 = arith.constant 0 : index
    %96 = vector.load %arg7[%c0_60, %c0_61, %c0_62] : memref<1x4x512xf32, #tpu.memory_space<vmem>>, vector<1x4x512xf32>
    %97 = vector.shape_cast %96 : vector<1x4x512xf32> to vector<4x512xf32>
    %98 = vector.shape_cast %95 : vector<4x512xf32> to vector<1x4x512xf32>
    tpu.vector_store %arg7[%c0_60, %c0_61, %c0_62], %98 {strides = array<i32>} : memref<1x4x512xf32, #tpu.memory_space<vmem>>, vector<1x4x512xf32>,
    return
  }
  func.func @transform_0(%arg0: i32) -> (i32, i32, i32) {
    %c0_i32 = arith.constant 0 : i32
    %c0_i32_0 = arith.constant 0 : i32
    %c0_i32_1 = arith.constant 0 : i32
    %c0_i32_2 = arith.constant 0 : i32
    return %c0_i32, %c0_i32_0, %c0_i32_1 : i32, i32, i32
  }
  func.func @transform_1(%arg0: i32) -> (i32, i32, i32) {
    %c0_i32 = arith.constant 0 : i32
    %c0_i32_0 = arith.constant 0 : i32
    %c0_i32_1 = arith.constant 0 : i32
    return %arg0, %c0_i32, %c0_i32_0 : i32, i32, i32
  }
  func.func @transform_2(%arg0: i32) -> (i32, i32) {
    %c0_i32 = arith.constant 0 : i32
    %c0_i32_0 = arith.constant 0 : i32
    %c0_i32_1 = arith.constant 0 : i32
    return %c0_i32, %c0_i32_0 : i32, i32
  }
  func.func @transform_3(%arg0: i32) -> (i32, i32) {
    %c0_i32 = arith.constant 0 : i32
    %c0_i32_0 = arith.constant 0 : i32
    %c0_i32_1 = arith.constant 0 : i32
    return %c0_i32, %c0_i32_0 : i32, i32
  }
  func.func @transform_4(%arg0: i32) -> (i32, i32) {
    %c0_i32 = arith.constant 0 : i32
    %c0_i32_0 = arith.constant 0 : i32
    %c0_i32_1 = arith.constant 0 : i32
    return %c0_i32, %c0_i32_0 : i32, i32
  }
  func.func @transform_5(%arg0: i32) -> (i32, i32) {
    %c0_i32 = arith.constant 0 : i32
    %c0_i32_0 = arith.constant 0 : i32
    %c0_i32_1 = arith.constant 0 : i32
    return %c0_i32, %c0_i32_0 : i32, i32
  }
  func.func @transform_6(%arg0: i32) -> (i32, i32, i32) {
    %c0_i32 = arith.constant 0 : i32
    %c0_i32_0 = arith.constant 0 : i32
    %c0_i32_1 = arith.constant 0 : i32
    return %arg0, %c0_i32, %c0_i32_0 : i32, i32, i32
  }
}

</mosaic_0001>

<bundles_post_ra>
// kernel: basic_block_forward.1
= control target key start
LH: loop header
LB: loop body
LE: loop exit
PB: predicated region body
PF: predicated region fallthrough
CT: control target
= control target key end

     0   :  { %s608_s25 = smov 111   ;;  %s609_s26 = smov 112   ;;  %v35_v6 = vlaneseq  ;;  %vm259_vm8 = vcmask 588800   ;;  %vm571_vm9 = vcmask 1043456   ;;  %s1209_s1 = inlined_call_operand.vmem [shape: f32[1,8,512], index: 1, kind: input, shape index: {}]   ;;  %s1210_s0 = inlined_call_operand.vmem [shape: f32[9,1,512], index: 0, kind: input, shape index: {}]   ;;  %s1211_s3 = inlined_call_operand.vmem [shape: f32[8,1], index: 3, kind: input, shape index: {}]   ;;  %s1212_s2 = inlined_call_operand.vmem [shape: f32[8,72], index: 2, kind: input, shape index: {}]   ;;  %s1213_s5 = inlined_call_operand.vmem [shape: f32[4,1], index: 5, kind: input, shape index: {}]   ;;  %s1214_s4 = inlined_call_operand.vmem [shape: f32[4,72], index: 4, kind: input, shape index: {}]   ;;  %s1215_s6 = inlined_call_operand.vmem [shape: f32[1,4,512], index: 6, kind: output, shape index: {}]  }
   0x1   :  { %v655_v0 = vld [vmem:[%s1209_s1 + $0x10] sm:$0xff]  ;;  %v660_v1 = vld [vmem:[%s1209_s1] sm:$0xff]  ;;  %v671_v2 = vld [vmem:[%s1209_s1 + $0x18] sm:$0xff]  ;;  %s610_s29 = smov 113   ;;  %s611_s30 = smov 127  }
   0x2   :  { %228 = vrot.lane.b32.xlu2 %v655_v0, %s608_s25  ;;  %196 = vrot.lane.b32.xlu1 %v660_v1, %s609_s26  ;;  %v688_v3 = vld [vmem:[%s1209_s1 + $0x8] sm:$0xff]  ;;  %s612_s9 = smov 1   ;;  %s613_s1 = smov 15   ;;  %v740_v8 = vand.u32 127, %v35_v6  ;;  %v745_v9 = vld [vmem:[%s1210_s0 + $0x20] sm:$0xf] }
   0x3   :  { %224 = vrot.lane.b32.xlu0 %v660_v1, %s608_s25  ;;  %s614_s10 = smov 16   ;;  %s615_s11 = smov 17   ;;  %v241_v10 = vperm.slane %v745_v9, 1  ;;  %v240_v11 = vperm.slane %v745_v9, 0  ;;  %v761_v19 = vld [vmem:[%s1210_s0 + $0x1c] sm:$0xf] }
   0x4   :  { %vm232_vm0 = vcmp.lt.s32.totalorder %v740_v8, 111  ;;  %vm204_vm1 = vcmp.lt.s32.totalorder %v740_v8, 112  ;;  %v242_v20 = vperm.slane %v745_v9, 2  ;;  %v243_v21 = vperm.slane %v745_v9, 3  ;;  %v780_v30 = vld [vmem:[%s1210_s0 + $0x18] sm:$0xf] }
   0x5   :  { %v215_v24 = vperm.slane %v761_v19, 3  ;;  %v214_v32 = vperm.slane %v761_v19, 2  ;;  %vm176_vm2 = vcmp.lt.s32.totalorder %v740_v8, 113  ;;  %v187_v33 = vperm.slane %v780_v30, 3  ;;  %v801_v41 = vld [vmem:[%s1210_s0 + $0x14] sm:$0xf] }
   0x6   :  { %v186_v42 = vperm.slane %v780_v30, 2  ;;  %vm148_vm3 = vcmp.lt.s32.totalorder %v740_v8, 127  ;;  %v159_v43 = vperm.slane %v801_v41, 3  ;;  %v212_v51 = vperm.slane %v761_v19, 0  ;;  %v834_v62 = vld [vmem:[%s1210_s0 + $0xc] sm:$0xf] }
   0x7   :  { %v213_v52 = vperm.slane %v761_v19, 1  ;;  %v158_v53 = vperm.slane %v801_v41, 2  ;;  %v185_v6 = vperm.slane %v780_v30, 1  ;;  %vm120_vm4 = vcmp.lt.s32.totalorder %v740_v8, 1 }
   0x8   :  { %vm92_vm5 = vcmp.lt.s32.totalorder %v740_v8, 15  ;;  %vm64_vm6 = vcmp.lt.s32.totalorder %v740_v8, 16  ;;  %vm37_vm7 = vcmp.lt.s32.totalorder %v740_v8, 17 }
   0xa   :  { %168 = vrot.lane.b32.xlu2 %v660_v1, %s610_s29  ;;  %202 = vrot.lane.b32.xlu1 %v671_v2, %s609_s26 }
   0xb   :  { %230 = vrot.lane.b32.xlu0 %v671_v2, %s608_s25 }
  0x12   :  { %140 = vrot.lane.b32.xlu2 %v660_v1, %s611_s30  ;;  %200 = vrot.lane.b32.xlu1 %v655_v0, %s609_s26 }
  0x13   :  { %174 = vrot.lane.b32.xlu0 %v671_v2, %s610_s29 }
  0x1a   :  { %226 = vrot.lane.b32.xlu2 %v688_v3, %s608_s25  ;;  %172 = vrot.lane.b32.xlu1 %v655_v0, %s610_s29 }
  0x1b   :  { %146 = vrot.lane.b32.xlu0 %v671_v2, %s611_s30 }
  0x22   :  { %116 = vrot.lane.b32.xlu2 %v655_v0, %s612_s9  ;;  %198 = vrot.lane.b32.xlu1 %v688_v3, %s609_s26 }
  0x23   :  { %144 = vrot.lane.b32.xlu0 %v655_v0, %s611_s30 }
  0x2a   :  { %88 = vrot.lane.b32.xlu2 %v655_v0, %s613_s1  ;;  %170 = vrot.lane.b32.xlu1 %v688_v3, %s610_s29 }
  0x2b   :  { %118 = vrot.lane.b32.xlu0 %v671_v2, %s612_s9 }
  0x32   :  { %142 = vrot.lane.b32.xlu2 %v688_v3, %s611_s30  ;;  %114 = vrot.lane.b32.xlu1 %v688_v3, %s612_s9 }
  0x33   :  { %90 = vrot.lane.b32.xlu0 %v671_v2, %s613_s1 }
  0x3a   :  { %86 = vrot.lane.b32.xlu2 %v688_v3, %s613_s1  ;;  %62 = vrot.lane.b32.xlu1 %v671_v2, %s614_s10 }
  0x3b   :  { %60 = vrot.lane.b32.xlu0 %v655_v0, %s614_s10 }
  0x42   :  { %58 = vrot.lane.b32.xlu2 %v688_v3, %s614_s10  ;;  %33 = vrot.lane.b32.xlu1 %v671_v2, %s615_s11 }
  0x43   :  { %31 = vrot.lane.b32.xlu0 %v655_v0, %s615_s11 }
  0x4a   :  { %84 = vrot.lane.b32.xlu2 %v660_v1, %s613_s1  ;;  %29 = vrot.lane.b32.xlu1 %v688_v3, %s615_s11 }
  0x4b   :  { %112 = vrot.lane.b32.xlu0 %v660_v1, %s612_s9 }
  0x52   :  { %27 = vrot.lane.b32.xlu1 %v660_v1, %s615_s11 }
  0x53   :  { %56 = vrot.lane.b32.xlu0 %v660_v1, %s614_s10 }
  0x5c   :  { %v229_v4 = vpop.permute.xlu2 %228 }
  0x64   :  { %v736_v5 = vpop.permute.xlu2 %168 }
  0x6c   :  { %v738_v7 = vpop.permute.xlu2 %140 }
  0x74   :  { %v227_v12 = vpop.permute.xlu2 %226  ;;  %v197_v13 = vpop.permute.xlu1 %196 }
  0x75   :  { %v225_v14 = vpop.permute.xlu0 %224  ;;  %v234_v15 = vsel %vm232_vm0, %v227_v12, %v229_v4 }
  0x76   :  { %v235_v16 = vsel %vm232_vm0, %v225_v14, %v227_v12  ;;  %v249_v17 = vmul.f32 %v241_v10, %v234_v15  ;;  %v131_v12 = vperm.slane %v834_v62, 3  ;;  %v157_v15 = vperm.slane %v801_v41, 1 }
  0x77   :  { %v248_v18 = vmul.f32 %v240_v11, %v235_v16 }
  0x78   :  { %290 = vmatpush.msra.mxu1 %v249_v17 }
  0x79   :  { %270 = vmatpush.msra.mxu0 %v248_v18 }
  0x7c   :  { %v203_v22 = vpop.permute.xlu1 %202  ;;  %v787_v35 = vpop.permute.xlu2 %116 }
  0x7d   :  { %v231_v23 = vpop.permute.xlu0 %230  ;;  %v208_v25 = vsel %vm204_vm1, %v203_v22, %v197_v13 }
  0x7e   :  { %v233_v26 = vsel %vm232_vm0, %v229_v4, %v231_v23  ;;  %v236_v27 = vsel %vm232_vm0, %v231_v23, %v225_v14  ;;  %v223_v31 = vmul.f32 %v215_v24, %v208_v25  ;;  %v184_v4 = vperm.slane %v780_v30, 0 }
  0x7f   :  { %v250_v28 = vmul.f32 %v242_v20, %v233_v26  ;;  %v251_v29 = vmul.f32 %v243_v21, %v236_v27  ;;  %v156_v14 = vperm.slane %v801_v41, 0 }
  0x81   :  { %310 = vmatpush.msra.mxu2 %v250_v28  ;;  %330 = vmatpush.msra.mxu3 %v251_v29  ;;  %v872_v29 = vld [vmem:[%s1210_s0 + $0x8] sm:$0xf] }
  0x83   :  { %331 = vmatpush.msra.mxu3 %v223_v31  ;;  %v130_v31 = vperm.slane %v834_v62, 2 }
  0x84   :  { %v201_v34 = vpop.permute.xlu1 %200  ;;  %v89_v49 = vpop.permute.xlu2 %88 }
  0x85   :  { %v205_v36 = vsel %vm204_vm1, %v201_v34, %v203_v22  ;;  %v175_v37 = vpop.permute.xlu0 %174 }
  0x86   :  { %v180_v38 = vsel %vm176_vm2, %v175_v37, %v736_v5  ;;  %v222_v39 = vmul.f32 %v214_v32, %v205_v36  ;;  %v103_v36 = vperm.slane %v872_v29, 3 }
  0x87   :  { %v195_v40 = vmul.f32 %v187_v33, %v180_v38  ;;  %v102_v38 = vperm.slane %v872_v29, 2 }
  0x88   :  { %311 = vmatpush.msra.mxu2 %v222_v39 }
  0x89   :  { %332 = vmatpush.msra.mxu3 %v195_v40 }
  0x8c   :  { %v173_v44 = vpop.permute.xlu1 %172  ;;  %v143_v63 = vpop.permute.xlu2 %142 }
  0x8d   :  { %v177_v45 = vsel %vm176_vm2, %v173_v44, %v175_v37  ;;  %v147_v46 = vpop.permute.xlu0 %146  ;;  %v151_v16 = vsel %vm148_vm3, %v738_v7, %v143_v63 }
  0x8e   :  { %v152_v47 = vsel %vm148_vm3, %v147_v46, %v738_v7  ;;  %v194_v48 = vmul.f32 %v186_v42, %v177_v45 }
  0x8f   :  { %v167_v50 = vmul.f32 %v159_v43, %v152_v47 }
  0x90   :  { %312 = vmatpush.msra.mxu2 %v194_v48 }
  0x91   :  { %333 = vmatpush.msra.mxu3 %v167_v50  ;;  %v896_v50 = vld [vmem:[%s1210_s0 + $0x4] sm:$0xf] }
  0x93   :  { %334 = vmatpush.msra.mxu3 %v671_v2 }
  0x94   :  { %v199_v54 = vpop.permute.xlu1 %198 }
  0x95   :  { %v206_v55 = vsel %vm204_vm1, %v199_v54, %v201_v34  ;;  %v207_v56 = vsel %vm204_vm1, %v197_v13, %v199_v54  ;;  %v145_v57 = vpop.permute.xlu0 %144  ;;  %v87_v34 = vpop.permute.xlu2 %86 }
  0x96   :  { %v149_v58 = vsel %vm148_vm3, %v145_v57, %v147_v46  ;;  %v220_v59 = vmul.f32 %v212_v51, %v207_v56  ;;  %v221_v60 = vmul.f32 %v213_v52, %v206_v55  ;;  %v150_v17 = vsel %vm148_vm3, %v143_v63, %v145_v57  ;;  %v253_v55 = vld [vmem:[%s1211_s3] sm:$0xff] }
  0x97   :  { %v166_v61 = vmul.f32 %v158_v53, %v149_v58  ;;  %v165_v28 = vmul.f32 %v157_v15, %v150_v17  ;;  %v94_v39 = vsel %vm92_vm5, %v87_v34, %v89_v49  ;;  %v616_v58 = vmov 0  }
  0x98   :  { %271 = vmatpush.msra.mxu0 %v220_v59  ;;  %291 = vmatpush.msra.mxu1 %v221_v60  ;;  %v110_v48 = vmul.f32 %v102_v38, %v94_v39 }
  0x99   :  { %313 = vmatpush.msra.mxu2 %v166_v61  ;;  %606 = vset.pattern.permute.xlu2 %v616_v58 }
  0x9a   :  { %607 = vset.pattern.permute.xlu0 %v616_v58  ;;  %256 = vperm.xlu2 %606, %v253_v55  }
  0x9b   :  { %314 = vmatpush.msra.mxu2 %v655_v0 }
  0x9c   :  { %v171_v13 = vpop.permute.xlu1 %170 }
  0x9d   :  { %v178_v18 = vsel %vm176_vm2, %v171_v13, %v173_v44  ;;  %v179_v22 = vsel %vm176_vm2, %v736_v5, %v171_v13  ;;  %v853_v23 = vpop.permute.xlu0 %118  ;;  %v164_v5 = vmul.f32 %v156_v14, %v151_v16  ;;  %v59_v56 = vpop.permute.xlu2 %58  ;;  %v915_v13 = vld [vmem:[%s1210_s0] sm:$0xf] }
  0x9e   :  { %v121_v25 = vsel %vm120_vm4, %v787_v35, %v853_v23  ;;  %v192_v7 = vmul.f32 %v184_v4, %v179_v22  ;;  %v193_v26 = vmul.f32 %v185_v6, %v178_v18  ;;  %v47_v16 = vperm.slane %v915_v13, 3 }
  0x9f   :  { %v139_v27 = vmul.f32 %v131_v12, %v121_v25 }
  0xa0   :  { %272 = vmatpush.msra.mxu0 %v192_v7  ;;  %292 = vmatpush.msra.mxu1 %v193_v26  ;;  %v252_v7 = vld [vmem:[%s1212_s2] sm:$0xff]  ;;  %v46_v26 = vperm.slane %v915_v13, 2 }
  0xa1   :  { %335 = vmatpush.msra.mxu3 %v139_v27 }
  0xa2   :  { %273 = vmatpush.msra.mxu0 %v164_v5  ;;  %293 = vmatpush.msra.mxu1 %v165_v28  ;;  %v128_v5 = vperm.slane %v834_v62, 0  ;;  %v129_v28 = vperm.slane %v834_v62, 1 }
  0xa4   :  { %v115_v37 = vpop.permute.xlu1 %114  ;;  %274 = vmatpush.msra.mxu0 %v660_v1  ;;  %294 = vmatpush.msra.mxu1 %v688_v3 }
  0xa5   :  { %v122_v40 = vsel %vm120_vm4, %v115_v37, %v787_v35  ;;  %v91_v44 = vpop.permute.xlu0 %90  ;;  %v74_v35 = vperm.slane %v896_v50, 2  ;;  %v85_v27 = vpop.permute.xlu2 %84 }
  0xa6   :  { %v93_v45 = vsel %vm92_vm5, %v89_v49, %v91_v44  ;;  %v138_v46 = vmul.f32 %v130_v31, %v122_v40  ;;  %v75_v49 = vperm.slane %v896_v50, 3  ;;  %v95_v40 = vsel %vm92_vm5, %v85_v27, %v87_v34 }
  0xa7   :  { %v111_v47 = vmul.f32 %v103_v36, %v93_v45  ;;  %v96_v55 = vsel %vm92_vm5, %v91_v44, %v85_v27 }
  0xa8   :  { %315 = vmatpush.msra.mxu2 %v138_v46 }
  0xa9   :  { %336 = vmatpush.msra.mxu3 %v111_v47  ;;  %v100_v47 = vperm.slane %v872_v29, 0 }
  0xaa   :  { %316 = vmatpush.msra.mxu2 %v110_v48  ;;  %v101_v48 = vperm.slane %v872_v29, 1 }
  0xab   :  { %v108_v44 = vmul.f32 %v100_v47, %v96_v55 }
  0xac   :  { %v63_v54 = vpop.permute.xlu1 %62 }
  0xad   :  { %v61_v57 = vpop.permute.xlu0 %60 }
  0xae   :  { %v65_v59 = vsel %vm64_vm6, %v61_v57, %v63_v54  ;;  %v66_v60 = vsel %vm64_vm6, %v59_v56, %v61_v57 }
  0xaf   :  { %v82_v61 = vmul.f32 %v74_v35, %v66_v60  ;;  %v83_v63 = vmul.f32 %v75_v49, %v65_v59 }
  0xb1   :  { %317 = vmatpush.msra.mxu2 %v82_v61  ;;  %337 = vmatpush.msra.mxu3 %v83_v63  ;;  %v1218_v61 = vperm.slane %v896_v50, 1 }
  0xb4   :  { %v34_v17 = vpop.permute.xlu1 %33 }
  0xb5   :  { %v32_v18 = vpop.permute.xlu0 %31 }
  0xb6   :  { %v38_v22 = vsel %vm37_vm7, %v32_v18, %v34_v17 }
  0xb7   :  { %v55_v25 = vmul.f32 %v47_v16, %v38_v22  ;;  %v1217_v22 = vperm.slane %v915_v13, 0 }
  0xb9   :  { %338 = vmatpush.msra.mxu3 %v55_v25  ;;  %v1216_v25 = vperm.slane %v915_v13, 1 }
  0xba   :  { %592 = vmatmul.msk.f32.vlgmr.msra.gmra.mxu3 %vm259_vm8, %v252_v7 }
  0xbc   :  { %v30_v39 = vpop.permute.xlu1 %29 }
  0xbd   :  { %v39_v45 = vsel %vm37_vm7, %v30_v39, %v32_v18  ;;  %v113_v46 = vpop.permute.xlu0 %112 }
  0xbe   :  { %v123_v57 = vsel %vm120_vm4, %v113_v46, %v115_v37  ;;  %v124_v58 = vsel %vm120_vm4, %v853_v23, %v113_v46  ;;  %v54_v34 = vmul.f32 %v46_v26, %v39_v45  ;;  %v109_v37 = vmul.f32 %v101_v48, %v95_v40 }
  0xbf   :  { %v136_v59 = vmul.f32 %v128_v5, %v124_v58  ;;  %v137_v60 = vmul.f32 %v129_v28, %v123_v57  ;;  %v1219_v23 = vperm.slane %v896_v50, 0 }
  0xc0   :  { %318 = vmatpush.msra.mxu2 %v54_v34 }
  0xc1   :  { %275 = vmatpush.msra.mxu0 %v136_v59  ;;  %295 = vmatpush.msra.mxu1 %v137_v60 }
  0xc2   :  { %591 = vmatmul.msk.f32.vlgmr.msra.gmra.mxu2 %vm259_vm8, %v252_v7 }
  0xc3   :  { %276 = vmatpush.msra.mxu0 %v108_v44  ;;  %296 = vmatpush.msra.mxu1 %v109_v37 }
  0xc4   :  { %v28_v63 = vpop.permute.xlu1 %27 }
  0xc5   :  { %v57_v18 = vpop.permute.xlu0 %56  ;;  %v40_v27 = vsel %vm37_vm7, %v28_v63, %v30_v39  ;;  %v41_v40 = vsel %vm37_vm7, %v34_v17, %v28_v63  ;;  %v472_v63 = vld [vmem:[%s1213_s5] sm:$0xf] }
  0xc6   :  { %v67_v45 = vsel %vm64_vm6, %v57_v18, %v59_v56  ;;  %v68_v46 = vsel %vm64_vm6, %v63_v54, %v57_v18  ;;  %v52_v39 = vmul.f32 %v1217_v22, %v41_v40  ;;  %v53_v17 = vmul.f32 %v1216_v25, %v40_v27 }
  0xc7   :  { %v80_v55 = vmul.f32 %v1219_v23, %v68_v46  ;;  %v81_v57 = vmul.f32 %v1218_v61, %v67_v45 }
  0xc9   :  { %277 = vmatpush.msra.mxu0 %v80_v55  ;;  %297 = vmatpush.msra.mxu1 %v81_v57 }
  0xcb   :  { %278 = vmatpush.msra.mxu0 %v52_v39  ;;  %298 = vmatpush.msra.mxu1 %v53_v17 }
  0xcc   :  { %589 = vmatmul.msk.f32.vlgmr.msra.gmra.mxu0 %vm259_vm8, %v252_v7  ;;  %590 = vmatmul.msk.f32.vlgmr.msra.gmra.mxu1 %vm259_vm8, %v252_v7 }
  0xf4   :  { %v257_v54 = vpop.permute.xlu2 %256 }
 0x13d   :  { %v340_v7 = vpop.f32.mrf.mxu3 }
 0x13e   :  { %v986_v60 = vadd.f32 %v340_v7, %v257_v54 }
 0x145   :  { %v320_v44 = vpop.f32.mrf.mxu2 }
 0x146   :  { %v1005_v37 = vadd.f32 %v320_v44, %v257_v54 }
 0x149   :  { %v280_v56 = vpop.f32.mrf.mxu0  ;;  %v300_v58 = vpop.f32.mrf.mxu1 }
 0x14a   :  { %v281_v34 = vadd.f32 %v280_v56, %v257_v54  ;;  %v976_v59 = vadd.f32 %v300_v58, %v257_v54 }
 0x14c   :  { %441 = vrot.lane.b32.xlu1 %v976_v59, %s609_s26  ;;  %439 = vrot.lane.b32.xlu2 %v281_v34, %s609_s26 }
 0x14d   :  { %455 = vrot.lane.b32.xlu0 %v281_v34, %s608_s25 }
 0x154   :  { %425 = vrot.lane.b32.xlu1 %v976_v59, %s610_s29  ;;  %423 = vrot.lane.b32.xlu2 %v281_v34, %s610_s29 }
 0x155   :  { %391 = vrot.lane.b32.xlu0 %v281_v34, %s612_s9 }
 0x15c   :  { %393 = vrot.lane.b32.xlu1 %v976_v59, %s612_s9  ;;  %407 = vrot.lane.b32.xlu2 %v281_v34, %s611_s30 }
 0x15d   :  { %445 = vrot.lane.b32.xlu0 %v986_v60, %s609_s26 }
 0x164   :  { %345 = vrot.lane.b32.xlu1 %v976_v59, %s615_s11  ;;  %457 = vrot.lane.b32.xlu2 %v976_v59, %s608_s25 }
 0x165   :  { %429 = vrot.lane.b32.xlu0 %v986_v60, %s610_s29 }
 0x16c   :  { %461 = vrot.lane.b32.xlu1 %v986_v60, %s608_s25  ;;  %409 = vrot.lane.b32.xlu2 %v976_v59, %s611_s30 }
 0x16d   :  { %413 = vrot.lane.b32.xlu0 %v986_v60, %s611_s30 }
 0x174   :  { %459 = vrot.lane.b32.xlu1 %v1005_v37, %s608_s25  ;;  %377 = vrot.lane.b32.xlu2 %v976_v59, %s613_s1 }
 0x175   :  { %411 = vrot.lane.b32.xlu0 %v1005_v37, %s611_s30 }
 0x17c   :  { %443 = vrot.lane.b32.xlu1 %v1005_v37, %s609_s26  ;;  %361 = vrot.lane.b32.xlu2 %v976_v59, %s614_s10 }
 0x17d   :  { %397 = vrot.lane.b32.xlu0 %v986_v60, %s612_s9 }
 0x184   :  { %427 = vrot.lane.b32.xlu1 %v1005_v37, %s610_s29  ;;  %395 = vrot.lane.b32.xlu2 %v1005_v37, %s612_s9 }
 0x185   :  { %381 = vrot.lane.b32.xlu0 %v986_v60, %s613_s1 }
 0x18c   :  { %365 = vrot.lane.b32.xlu1 %v986_v60, %s614_s10  ;;  %379 = vrot.lane.b32.xlu2 %v1005_v37, %s613_s1 }
 0x18d   :  { %363 = vrot.lane.b32.xlu0 %v1005_v37, %s614_s10 }
 0x194   :  { %349 = vrot.lane.b32.xlu1 %v986_v60, %s615_s11  ;;  %375 = vrot.lane.b32.xlu2 %v281_v34, %s613_s1 }
 0x195   :  { %347 = vrot.lane.b32.xlu0 %v1005_v37, %s615_s11 }
 0x19c   :  { %343 = vrot.lane.b32.xlu1 %v281_v34, %s615_s11  ;;  %475 = vperm.xlu2 %606, %v472_v63  }
 0x19d   :  { %359 = vrot.lane.b32.xlu0 %v281_v34, %s614_s10 }
 0x1a6   :  { %v440_v18 = vpop.permute.xlu2 %439 }
 0x1ae   :  { %v424_v27 = vpop.permute.xlu2 %423 }
 0x1b6   :  { %v408_v40 = vpop.permute.xlu2 %407 }
 0x1be   :  { %v442_v45 = vpop.permute.xlu1 %441  ;;  %v458_v46 = vpop.permute.xlu2 %457 }
 0x1bf   :  { %v456_v55 = vpop.permute.xlu0 %455  ;;  %v449_v57 = vsel %vm204_vm1, %v440_v18, %v442_v45 }
 0x1c0   :  { %v465_v39 = vsel %vm232_vm0, %v456_v55, %v458_v46  ;;  %v451_v54 = vmul.f32 %v449_v57, %v212_v51 }
 0x1c1   :  { %v467_v17 = vmul.f32 %v465_v39, %v240_v11 }
 0x1c3   :  { %488 = vmatpush.msrb.mxu0 %v467_v17 }
 0x1c5   :  { %489 = vmatpush.msrb.mxu0 %v451_v54 }
 0x1c6   :  { %v426_v56 = vpop.permute.xlu1 %425  ;;  %v410_v58 = vpop.permute.xlu2 %409 }
 0x1c7   :  { %v433_v7 = vsel %vm176_vm2, %v424_v27, %v426_v56  ;;  %v417_v44 = vsel %vm148_vm3, %v408_v40, %v410_v58  ;;  %v1053_v63 = vpop.permute.xlu0 %391 }
 0x1c8   :  { %v435_v25 = vmul.f32 %v433_v7, %v184_v4  ;;  %v419_v11 = vmul.f32 %v417_v44, %v156_v14 }
 0x1ca   :  { %490 = vmatpush.msrb.mxu0 %v435_v25 }
 0x1cc   :  { %491 = vmatpush.msrb.mxu0 %v419_v11 }
 0x1ce   :  { %v1059_v51 = vpop.permute.xlu1 %393  ;;  %492 = vmatpush.msrb.mxu0 %v281_v34  ;;  %v1061_v57 = vpop.permute.xlu2 %377 }
 0x1cf   :  { %v446_v39 = vpop.permute.xlu0 %445  ;;  %v401_v30 = vsel %vm120_vm4, %v1053_v63, %v1059_v51 }
 0x1d0   :  { %v450_v4 = vsel %vm204_vm1, %v446_v39, %v440_v18 }
 0x1d1   :  { %v454_v44 = vmul.f32 %v450_v4, %v215_v24 }
 0x1d6   :  { %v1063_v17 = vpop.permute.xlu1 %345  ;;  %v1065_v22 = vpop.permute.xlu2 %361 }
 0x1d7   :  { %v430_v54 = vpop.permute.xlu0 %429 }
 0x1d8   :  { %v434_v34 = vsel %vm176_vm2, %v430_v54, %v424_v27 }
 0x1d9   :  { %v438_v18 = vmul.f32 %v434_v34, %v187_v33 }
 0x1de   :  { %v462_v61 = vpop.permute.xlu1 %461  ;;  %v396_v11 = vpop.permute.xlu2 %395 }
 0x1df   :  { %v466_v25 = vsel %vm232_vm0, %v462_v61, %v456_v55  ;;  %v414_v14 = vpop.permute.xlu0 %413 }
 0x1e0   :  { %v470_v7 = vmul.f32 %v466_v25, %v243_v21  ;;  %v418_v23 = vsel %vm148_vm3, %v414_v14, %v408_v40 }
 0x1e1   :  { %v422_v21 = vmul.f32 %v418_v23, %v159_v43 }
 0x1e2   :  { %548 = vmatpush.msrb.mxu3 %v470_v7 }
 0x1e4   :  { %549 = vmatpush.msrb.mxu3 %v454_v44 }
 0x1e6   :  { %v460_v55 = vpop.permute.xlu1 %459  ;;  %550 = vmatpush.msrb.mxu3 %v438_v18  ;;  %v380_v33 = vpop.permute.xlu2 %379 }
 0x1e7   :  { %v463_v27 = vsel %vm232_vm0, %v460_v55, %v462_v61  ;;  %v464_v25 = vsel %vm232_vm0, %v458_v46, %v460_v55  ;;  %v412_v24 = vpop.permute.xlu0 %411 }
 0x1e8   :  { %551 = vmatpush.msrb.mxu3 %v422_v21  ;;  %v468_v40 = vmul.f32 %v464_v25, %v241_v10  ;;  %v469_v4 = vmul.f32 %v463_v27, %v242_v20  ;;  %v415_v34 = vsel %vm148_vm3, %v412_v24, %v414_v14 }
 0x1e9   :  { %v421_v21 = vmul.f32 %v415_v34, %v158_v53 }
 0x1ea   :  { %508 = vmatpush.msrb.mxu1 %v468_v40  ;;  %528 = vmatpush.msrb.mxu2 %v469_v4  ;;  %v1220_v40 = vperm.slane %v896_v50, 0 }
 0x1eb   :  { %552 = vmatpush.msrb.mxu3 %v986_v60 }
 0x1ee   :  { %v444_v43 = vpop.permute.xlu1 %443  ;;  %v376_v44 = vpop.permute.xlu2 %375 }
 0x1ef   :  { %v447_v23 = vsel %vm204_vm1, %v444_v43, %v446_v39  ;;  %v448_v61 = vsel %vm204_vm1, %v442_v45, %v444_v43  ;;  %v398_v46 = vpop.permute.xlu0 %397  ;;  %v385_v41 = vsel %vm92_vm5, %v376_v44, %v1061_v57 }
 0x1f0   :  { %v399_v7 = vsel %vm120_vm4, %v396_v11, %v398_v46  ;;  %v402_v9 = vsel %vm120_vm4, %v398_v46, %v1053_v63  ;;  %v452_v10 = vmul.f32 %v448_v61, %v213_v52  ;;  %v453_v20 = vmul.f32 %v447_v23, %v214_v32 }
 0x1f1   :  { %v403_v60 = vmul.f32 %v402_v9, %v128_v5  ;;  %v406_v45 = vmul.f32 %v399_v7, %v131_v12  ;;  %v416_v52 = vsel %vm148_vm3, %v410_v58, %v412_v24  ;;  %v1223_v61 = vperm.slane %v915_v13, 1 }
 0x1f2   :  { %509 = vmatpush.msrb.mxu1 %v452_v10  ;;  %529 = vmatpush.msrb.mxu2 %v453_v20 }
 0x1f3   :  { %493 = vmatpush.msrb.mxu0 %v403_v60  ;;  %553 = vmatpush.msrb.mxu3 %v406_v45 }
 0x1f6   :  { %v428_v39 = vpop.permute.xlu1 %427  ;;  %v476_v8 = vpop.permute.xlu2 %475 }
 0x1f7   :  { %v431_v19 = vsel %vm176_vm2, %v428_v39, %v430_v54  ;;  %v432_v32 = vsel %vm176_vm2, %v426_v56, %v428_v39  ;;  %v382_v5 = vpop.permute.xlu0 %381  ;;  %v420_v56 = vmul.f32 %v416_v52, %v157_v15  ;;  %v404_v15 = vmul.f32 %v401_v30, %v129_v28 }
 0x1f8   :  { %v383_v12 = vsel %vm92_vm5, %v380_v33, %v382_v5  ;;  %v386_v18 = vsel %vm92_vm5, %v382_v5, %v376_v44  ;;  %v436_v14 = vmul.f32 %v432_v32, %v185_v6  ;;  %v437_v58 = vmul.f32 %v431_v19, %v186_v42 }
 0x1f9   :  { %v387_v55 = vmul.f32 %v386_v18, %v100_v47  ;;  %v390_v54 = vmul.f32 %v383_v12, %v103_v36  ;;  %v400_v42 = vsel %vm120_vm4, %v1059_v51, %v396_v11  ;;  %v384_v6 = vsel %vm92_vm5, %v1061_v57, %v380_v33 }
 0x1fa   :  { %510 = vmatpush.msrb.mxu1 %v436_v14  ;;  %530 = vmatpush.msrb.mxu2 %v437_v58  ;;  %v405_v36 = vmul.f32 %v400_v42, %v130_v31  ;;  %v389_v63 = vmul.f32 %v384_v6, %v102_v38  ;;  %v1221_v33 = vperm.slane %v896_v50, 1 }
 0x1fb   :  { %494 = vmatpush.msrb.mxu0 %v387_v55  ;;  %554 = vmatpush.msrb.mxu3 %v390_v54 }
 0x1fc   :  { %511 = vmatpush.msrb.mxu1 %v420_v56  ;;  %531 = vmatpush.msrb.mxu2 %v421_v21 }
 0x1fe   :  { %v366_v53 = vpop.permute.xlu1 %365  ;;  %512 = vmatpush.msrb.mxu1 %v976_v59  ;;  %532 = vmatpush.msrb.mxu2 %v1005_v37  ;;  %v388_v59 = vmul.f32 %v385_v41, %v101_v48 }
 0x1ff   :  { %v364_v47 = vpop.permute.xlu0 %363 }
 0x200   :  { %v367_v51 = vsel %vm64_vm6, %v364_v47, %v366_v53  ;;  %v368_v57 = vsel %vm64_vm6, %v1065_v22, %v364_v47  ;;  %513 = vmatpush.msrb.mxu1 %v404_v15  ;;  %533 = vmatpush.msrb.mxu2 %v405_v36 }
 0x201   :  { %v374_v62 = vmul.f32 %v367_v51, %v75_v49  ;;  %v373_v31 = vmul.f32 %v368_v57, %v74_v35  ;;  %v471_v35 = vld [vmem:[%s1214_s4] sm:$0xf] }
 0x202   :  { %514 = vmatpush.msrb.mxu1 %v388_v59  ;;  %534 = vmatpush.msrb.mxu2 %v389_v63 }
 0x203   :  { %555 = vmatpush.msrb.mxu3 %v374_v62 }
 0x204   :  { %535 = vmatpush.msrb.mxu2 %v373_v31 }
 0x206   :  { %v350_v38 = vpop.permute.xlu1 %349 }
 0x207   :  { %v348_v28 = vpop.permute.xlu0 %347 }
 0x208   :  { %v351_v37 = vsel %vm37_vm7, %v348_v28, %v350_v38  ;;  %v352_v29 = vsel %vm37_vm7, %v1063_v17, %v348_v28 }
 0x209   :  { %v357_v48 = vmul.f32 %v352_v29, %v46_v26  ;;  %v358_v49 = vmul.f32 %v351_v37, %v47_v16 }
 0x20b   :  { %536 = vmatpush.msrb.mxu2 %v357_v48  ;;  %556 = vmatpush.msrb.mxu3 %v358_v49 }
 0x20c   :  { %595 = vmatmul.msk.f32.vlgmr.msrb.gmra.mxu2 %vm259_vm8, %v471_v35  ;;  %596 = vmatmul.msk.f32.vlgmr.msrb.gmra.mxu3 %vm259_vm8, %v471_v35 }
 0x20e   :  { %v344_v11 = vpop.permute.xlu1 %343 }
 0x20f   :  { %v360_v27 = vpop.permute.xlu0 %359  ;;  %v353_v25 = vsel %vm37_vm7, %v344_v11, %v1063_v17  ;;  %v354_v26 = vsel %vm37_vm7, %v350_v38, %v344_v11  ;;  %v1222_v17 = vperm.slane %v915_v13, 0 }
 0x210   :  { %v369_v16 = vsel %vm64_vm6, %v360_v27, %v1065_v22  ;;  %v370_v24 = vsel %vm64_vm6, %v366_v53, %v360_v27  ;;  %v356_v46 = vmul.f32 %v353_v25, %v1223_v61 }
 0x211   :  { %v371_v4 = vmul.f32 %v370_v24, %v1220_v40  ;;  %v372_v43 = vmul.f32 %v369_v16, %v1221_v33  ;;  %v355_v23 = vmul.f32 %v354_v26, %v1222_v17 }
 0x213   :  { %495 = vmatpush.msrb.mxu0 %v371_v4  ;;  %515 = vmatpush.msrb.mxu1 %v372_v43 }
 0x215   :  { %496 = vmatpush.msrb.mxu0 %v355_v23  ;;  %516 = vmatpush.msrb.mxu1 %v356_v46 }
 0x216   :  { %593 = vmatmul.msk.f32.vlgmr.msrb.gmra.mxu0 %vm259_vm8, %v471_v35  ;;  %594 = vmatmul.msk.f32.vlgmr.msrb.gmra.mxu1 %vm259_vm8, %v471_v35 }
 0x28f   :  { %v538_v22 = vpop.f32.mrf.mxu2  ;;  %v558_v7 = vpop.f32.mrf.mxu3 }
 0x290   :  { %v539_v9 = vadd.f32 %v538_v22, %v476_v8  ;;  %v559_v50 = vadd.f32 %v558_v7, %v476_v8 }
 0x292   :  { %v564_v10 = vadd.f32 %v559_v50, %v671_v2  ;;  %v563_v45 = vadd.f32 %v539_v9, %v655_v0 }
 0x293   :  { %v498_v20 = vpop.f32.mrf.mxu0  ;;  %v518_v60 = vpop.f32.mrf.mxu1 }
 0x294   :  { %v570_v13 = vrot.slane %v564_v10, 4  ;;  %v499_v39 = vadd.f32 %v498_v20, %v476_v8  ;;  %v519_v34 = vadd.f32 %v518_v60, %v476_v8 }
 0x296   :  { %v573_v52 = vsel %vm571_vm9, %v563_v45, %v570_v13  ;;  %v562_v44 = vadd.f32 %v519_v34, %v688_v3  ;;  %v561_v19 = vadd.f32 %v499_v39, %v660_v1 }
 0x297   :  { %577 = vst [vmem:[%s1215_s6 + $0x8] sm:$0xff] %v573_v52 }
 0x298   :  { %v569_v32 = vrot.slane %v562_v44, 4 }
 0x29a   :  { %v572_v5 = vsel %vm571_vm9, %v561_v19, %v569_v32 }
 0x29b   :  { %576 = vst [vmem:[%s1215_s6] sm:$0xff] %v572_v5 }

// kernel: basic_block_forward.1
= control target key start
LH: loop header
LB: loop body
LE: loop exit
PB: predicated region body
PF: predicated region fallthrough
CT: control target
= control target key end

     0   :  { %s608_s25 = smov 111   ;;  %s609_s26 = smov 112   ;;  %v35_v6 = vlaneseq  ;;  %vm259_vm8 = vcmask 588800   ;;  %vm571_vm9 = vcmask 1043456   ;;  %s1209_s1 = inlined_call_operand.vmem [shape: f32[1,8,512], index: 1, kind: input, shape index: {}]   ;;  %s1210_s0 = inlined_call_operand.vmem [shape: f32[9,1,512], index: 0, kind: input, shape index: {}]   ;;  %s1211_s3 = inlined_call_operand.vmem [shape: f32[8,1], index: 3, kind: input, shape index: {}]   ;;  %s1212_s2 = inlined_call_operand.vmem [shape: f32[8,72], index: 2, kind: input, shape index: {}]   ;;  %s1213_s5 = inlined_call_operand.vmem [shape: f32[4,1], index: 5, kind: input, shape index: {}]   ;;  %s1214_s4 = inlined_call_operand.vmem [shape: f32[4,72], index: 4, kind: input, shape index: {}]   ;;  %s1215_s6 = inlined_call_operand.vmem [shape: f32[1,4,512], index: 6, kind: output, shape index: {}]  }
   0x1   :  { %v655_v0 = vld [vmem:[%s1209_s1 + $0x10] sm:$0xff]  ;;  %v660_v1 = vld [vmem:[%s1209_s1] sm:$0xff]  ;;  %v671_v2 = vld [vmem:[%s1209_s1 + $0x18] sm:$0xff]  ;;  %s610_s29 = smov 113   ;;  %s611_s30 = smov 127  }
   0x2   :  { %228 = vrot.lane.b32.xlu2 %v655_v0, %s608_s25  ;;  %196 = vrot.lane.b32.xlu1 %v660_v1, %s609_s26  ;;  %v688_v3 = vld [vmem:[%s1209_s1 + $0x8] sm:$0xff]  ;;  %s612_s9 = smov 1   ;;  %s613_s1 = smov 15   ;;  %v740_v8 = vand.u32 127, %v35_v6  ;;  %v745_v9 = vld [vmem:[%s1210_s0 + $0x20] sm:$0xf] }
   0x3   :  { %224 = vrot.lane.b32.xlu0 %v660_v1, %s608_s25  ;;  %s614_s10 = smov 16   ;;  %s615_s11 = smov 17   ;;  %v241_v10 = vperm.slane %v745_v9, 1  ;;  %v240_v11 = vperm.slane %v745_v9, 0  ;;  %v761_v19 = vld [vmem:[%s1210_s0 + $0x1c] sm:$0xf] }
   0x4   :  { %vm232_vm0 = vcmp.lt.s32.totalorder %v740_v8, 111  ;;  %vm204_vm1 = vcmp.lt.s32.totalorder %v740_v8, 112  ;;  %v242_v20 = vperm.slane %v745_v9, 2  ;;  %v243_v21 = vperm.slane %v745_v9, 3  ;;  %v780_v30 = vld [vmem:[%s1210_s0 + $0x18] sm:$0xf] }
   0x5   :  { %v215_v24 = vperm.slane %v761_v19, 3  ;;  %v214_v32 = vperm.slane %v761_v19, 2  ;;  %vm176_vm2 = vcmp.lt.s32.totalorder %v740_v8, 113  ;;  %v187_v33 = vperm.slane %v780_v30, 3  ;;  %v801_v41 = vld [vmem:[%s1210_s0 + $0x14] sm:$0xf] }
   0x6   :  { %v186_v42 = vperm.slane %v780_v30, 2  ;;  %vm148_vm3 = vcmp.lt.s32.totalorder %v740_v8, 127  ;;  %v159_v43 = vperm.slane %v801_v41, 3  ;;  %v212_v51 = vperm.slane %v761_v19, 0  ;;  %v834_v62 = vld [vmem:[%s1210_s0 + $0xc] sm:$0xf] }
   0x7   :  { %v213_v52 = vperm.slane %v761_v19, 1  ;;  %v158_v53 = vperm.slane %v801_v41, 2  ;;  %v185_v6 = vperm.slane %v780_v30, 1  ;;  %vm120_vm4 = vcmp.lt.s32.totalorder %v740_v8, 1 }
   0x8   :  { %vm92_vm5 = vcmp.lt.s32.totalorder %v740_v8, 15  ;;  %vm64_vm6 = vcmp.lt.s32.totalorder %v740_v8, 16  ;;  %vm37_vm7 = vcmp.lt.s32.totalorder %v740_v8, 17 }
   0xa   :  { %168 = vrot.lane.b32.xlu2 %v660_v1, %s610_s29  ;;  %202 = vrot.lane.b32.xlu1 %v671_v2, %s609_s26 }
   0xb   :  { %230 = vrot.lane.b32.xlu0 %v671_v2, %s608_s25 }
  0x12   :  { %140 = vrot.lane.b32.xlu2 %v660_v1, %s611_s30  ;;  %200 = vrot.lane.b32.xlu1 %v655_v0, %s609_s26 }
  0x13   :  { %174 = vrot.lane.b32.xlu0 %v671_v2, %s610_s29 }
  0x1a   :  { %226 = vrot.lane.b32.xlu2 %v688_v3, %s608_s25  ;;  %172 = vrot.lane.b32.xlu1 %v655_v0, %s610_s29 }
  0x1b   :  { %146 = vrot.lane.b32.xlu0 %v671_v2, %s611_s30 }
  0x22   :  { %116 = vrot.lane.b32.xlu2 %v655_v0, %s612_s9  ;;  %198 = vrot.lane.b32.xlu1 %v688_v3, %s609_s26 }
  0x23   :  { %144 = vrot.lane.b32.xlu0 %v655_v0, %s611_s30 }
  0x2a   :  { %88 = vrot.lane.b32.xlu2 %v655_v0, %s613_s1  ;;  %170 = vrot.lane.b32.xlu1 %v688_v3, %s610_s29 }
  0x2b   :  { %118 = vrot.lane.b32.xlu0 %v671_v2, %s612_s9 }
  0x32   :  { %142 = vrot.lane.b32.xlu2 %v688_v3, %s611_s30  ;;  %114 = vrot.lane.b32.xlu1 %v688_v3, %s612_s9 }
  0x33   :  { %90 = vrot.lane.b32.xlu0 %v671_v2, %s613_s1 }
  0x3a   :  { %86 = vrot.lane.b32.xlu2 %v688_v3, %s613_s1  ;;  %62 = vrot.lane.b32.xlu1 %v671_v2, %s614_s10 }
  0x3b   :  { %60 = vrot.lane.b32.xlu0 %v655_v0, %s614_s10 }
  0x42   :  { %58 = vrot.lane.b32.xlu2 %v688_v3, %s614_s10  ;;  %33 = vrot.lane.b32.xlu1 %v671_v2, %s615_s11 }
  0x43   :  { %31 = vrot.lane.b32.xlu0 %v655_v0, %s615_s11 }
  0x4a   :  { %84 = vrot.lane.b32.xlu2 %v660_v1, %s613_s1  ;;  %29 = vrot.lane.b32.xlu1 %v688_v3, %s615_s11 }
  0x4b   :  { %112 = vrot.lane.b32.xlu0 %v660_v1, %s612_s9 }
  0x52   :  { %27 = vrot.lane.b32.xlu1 %v660_v1, %s615_s11 }
  0x53   :  { %56 = vrot.lane.b32.xlu0 %v660_v1, %s614_s10 }
  0x5c   :  { %v229_v4 = vpop.permute.xlu2 %228 }
  0x64   :  { %v736_v5 = vpop.permute.xlu2 %168 }
  0x6c   :  { %v738_v7 = vpop.permute.xlu2 %140 }
  0x74   :  { %v227_v12 = vpop.permute.xlu2 %226  ;;  %v197_v13 = vpop.permute.xlu1 %196 }
  0x75   :  { %v225_v14 = vpop.permute.xlu0 %224  ;;  %v234_v15 = vsel %vm232_vm0, %v227_v12, %v229_v4 }
  0x76   :  { %v235_v16 = vsel %vm232_vm0, %v225_v14, %v227_v12  ;;  %v249_v17 = vmul.f32 %v241_v10, %v234_v15  ;;  %v131_v12 = vperm.slane %v834_v62, 3  ;;  %v157_v15 = vperm.slane %v801_v41, 1 }
  0x77   :  { %v248_v18 = vmul.f32 %v240_v11, %v235_v16 }
  0x78   :  { %290 = vmatpush.msra.mxu1 %v249_v17 }
  0x79   :  { %270 = vmatpush.msra.mxu0 %v248_v18 }
  0x7c   :  { %v203_v22 = vpop.permute.xlu1 %202  ;;  %v787_v35 = vpop.permute.xlu2 %116 }
  0x7d   :  { %v231_v23 = vpop.permute.xlu0 %230  ;;  %v208_v25 = vsel %vm204_vm1, %v203_v22, %v197_v13 }
  0x7e   :  { %v233_v26 = vsel %vm232_vm0, %v229_v4, %v231_v23  ;;  %v236_v27 = vsel %vm232_vm0, %v231_v23, %v225_v14  ;;  %v223_v31 = vmul.f32 %v215_v24, %v208_v25  ;;  %v184_v4 = vperm.slane %v780_v30, 0 }
  0x7f   :  { %v250_v28 = vmul.f32 %v242_v20, %v233_v26  ;;  %v251_v29 = vmul.f32 %v243_v21, %v236_v27  ;;  %v156_v14 = vperm.slane %v801_v41, 0 }
  0x81   :  { %310 = vmatpush.msra.mxu2 %v250_v28  ;;  %330 = vmatpush.msra.mxu3 %v251_v29  ;;  %v872_v29 = vld [vmem:[%s1210_s0 + $0x8] sm:$0xf] }
  0x83   :  { %331 = vmatpush.msra.mxu3 %v223_v31  ;;  %v130_v31 = vperm.slane %v834_v62, 2 }
  0x84   :  { %v201_v34 = vpop.permute.xlu1 %200  ;;  %v89_v49 = vpop.permute.xlu2 %88 }
  0x85   :  { %v205_v36 = vsel %vm204_vm1, %v201_v34, %v203_v22  ;;  %v175_v37 = vpop.permute.xlu0 %174 }
  0x86   :  { %v180_v38 = vsel %vm176_vm2, %v175_v37, %v736_v5  ;;  %v222_v39 = vmul.f32 %v214_v32, %v205_v36  ;;  %v103_v36 = vperm.slane %v872_v29, 3 }
  0x87   :  { %v195_v40 = vmul.f32 %v187_v33, %v180_v38  ;;  %v102_v38 = vperm.slane %v872_v29, 2 }
  0x88   :  { %311 = vmatpush.msra.mxu2 %v222_v39 }
  0x89   :  { %332 = vmatpush.msra.mxu3 %v195_v40 }
  0x8c   :  { %v173_v44 = vpop.permute.xlu1 %172  ;;  %v143_v63 = vpop.permute.xlu2 %142 }
  0x8d   :  { %v177_v45 = vsel %vm176_vm2, %v173_v44, %v175_v37  ;;  %v147_v46 = vpop.permute.xlu0 %146  ;;  %v151_v16 = vsel %vm148_vm3, %v738_v7, %v143_v63 }
  0x8e   :  { %v152_v47 = vsel %vm148_vm3, %v147_v46, %v738_v7  ;;  %v194_v48 = vmul.f32 %v186_v42, %v177_v45 }
  0x8f   :  { %v167_v50 = vmul.f32 %v159_v43, %v152_v47 }
  0x90   :  { %312 = vmatpush.msra.mxu2 %v194_v48 }
  0x91   :  { %333 = vmatpush.msra.mxu3 %v167_v50  ;;  %v896_v50 = vld [vmem:[%s1210_s0 + $0x4] sm:$0xf] }
  0x93   :  { %334 = vmatpush.msra.mxu3 %v671_v2 }
  0x94   :  { %v199_v54 = vpop.permute.xlu1 %198 }
  0x95   :  { %v206_v55 = vsel %vm204_vm1, %v199_v54, %v201_v34  ;;  %v207_v56 = vsel %vm204_vm1, %v197_v13, %v199_v54  ;;  %v145_v57 = vpop.permute.xlu0 %144  ;;  %v87_v34 = vpop.permute.xlu2 %86 }
  0x96   :  { %v149_v58 = vsel %vm148_vm3, %v145_v57, %v147_v46  ;;  %v220_v59 = vmul.f32 %v212_v51, %v207_v56  ;;  %v221_v60 = vmul.f32 %v213_v52, %v206_v55  ;;  %v150_v17 = vsel %vm148_vm3, %v143_v63, %v145_v57  ;;  %v253_v55 = vld [vmem:[%s1211_s3] sm:$0xff] }
  0x97   :  { %v166_v61 = vmul.f32 %v158_v53, %v149_v58  ;;  %v165_v28 = vmul.f32 %v157_v15, %v150_v17  ;;  %v94_v39 = vsel %vm92_vm5, %v87_v34, %v89_v49  ;;  %v616_v58 = vmov 0  }
  0x98   :  { %271 = vmatpush.msra.mxu0 %v220_v59  ;;  %291 = vmatpush.msra.mxu1 %v221_v60  ;;  %v110_v48 = vmul.f32 %v102_v38, %v94_v39 }
  0x99   :  { %313 = vmatpush.msra.mxu2 %v166_v61  ;;  %606 = vset.pattern.permute.xlu2 %v616_v58 }
  0x9a   :  { %607 = vset.pattern.permute.xlu0 %v616_v58  ;;  %256 = vperm.xlu2 %606, %v253_v55  }
  0x9b   :  { %314 = vmatpush.msra.mxu2 %v655_v0 }
  0x9c   :  { %v171_v13 = vpop.permute.xlu1 %170 }
  0x9d   :  { %v178_v18 = vsel %vm176_vm2, %v171_v13, %v173_v44  ;;  %v179_v22 = vsel %vm176_vm2, %v736_v5, %v171_v13  ;;  %v853_v23 = vpop.permute.xlu0 %118  ;;  %v164_v5 = vmul.f32 %v156_v14, %v151_v16  ;;  %v59_v56 = vpop.permute.xlu2 %58  ;;  %v915_v13 = vld [vmem:[%s1210_s0] sm:$0xf] }
  0x9e   :  { %v121_v25 = vsel %vm120_vm4, %v787_v35, %v853_v23  ;;  %v192_v7 = vmul.f32 %v184_v4, %v179_v22  ;;  %v193_v26 = vmul.f32 %v185_v6, %v178_v18  ;;  %v47_v16 = vperm.slane %v915_v13, 3 }
  0x9f   :  { %v139_v27 = vmul.f32 %v131_v12, %v121_v25 }
  0xa0   :  { %272 = vmatpush.msra.mxu0 %v192_v7  ;;  %292 = vmatpush.msra.mxu1 %v193_v26  ;;  %v252_v7 = vld [vmem:[%s1212_s2] sm:$0xff]  ;;  %v46_v26 = vperm.slane %v915_v13, 2 }
  0xa1   :  { %335 = vmatpush.msra.mxu3 %v139_v27 }
  0xa2   :  { %273 = vmatpush.msra.mxu0 %v164_v5  ;;  %293 = vmatpush.msra.mxu1 %v165_v28  ;;  %v128_v5 = vperm.slane %v834_v62, 0  ;;  %v129_v28 = vperm.slane %v834_v62, 1 }
  0xa4   :  { %v115_v37 = vpop.permute.xlu1 %114  ;;  %274 = vmatpush.msra.mxu0 %v660_v1  ;;  %294 = vmatpush.msra.mxu1 %v688_v3 }
  0xa5   :  { %v122_v40 = vsel %vm120_vm4, %v115_v37, %v787_v35  ;;  %v91_v44 = vpop.permute.xlu0 %90  ;;  %v74_v35 = vperm.slane %v896_v50, 2  ;;  %v85_v27 = vpop.permute.xlu2 %84 }
  0xa6   :  { %v93_v45 = vsel %vm92_vm5, %v89_v49, %v91_v44  ;;  %v138_v46 = vmul.f32 %v130_v31, %v122_v40  ;;  %v75_v49 = vperm.slane %v896_v50, 3  ;;  %v95_v40 = vsel %vm92_vm5, %v85_v27, %v87_v34 }
  0xa7   :  { %v111_v47 = vmul.f32 %v103_v36, %v93_v45  ;;  %v96_v55 = vsel %vm92_vm5, %v91_v44, %v85_v27 }
  0xa8   :  { %315 = vmatpush.msra.mxu2 %v138_v46 }
  0xa9   :  { %336 = vmatpush.msra.mxu3 %v111_v47  ;;  %v100_v47 = vperm.slane %v872_v29, 0 }
  0xaa   :  { %316 = vmatpush.msra.mxu2 %v110_v48  ;;  %v101_v48 = vperm.slane %v872_v29, 1 }
  0xab   :  { %v108_v44 = vmul.f32 %v100_v47, %v96_v55 }
  0xac   :  { %v63_v54 = vpop.permute.xlu1 %62 }
  0xad   :  { %v61_v57 = vpop.permute.xlu0 %60 }
  0xae   :  { %v65_v59 = vsel %vm64_vm6, %v61_v57, %v63_v54  ;;  %v66_v60 = vsel %vm64_vm6, %v59_v56, %v61_v57 }
  0xaf   :  { %v82_v61 = vmul.f32 %v74_v35, %v66_v60  ;;  %v83_v63 = vmul.f32 %v75_v49, %v65_v59 }
  0xb1   :  { %317 = vmatpush.msra.mxu2 %v82_v61  ;;  %337 = vmatpush.msra.mxu3 %v83_v63  ;;  %v1218_v61 = vperm.slane %v896_v50, 1 }
  0xb4   :  { %v34_v17 = vpop.permute.xlu1 %33 }
  0xb5   :  { %v32_v18 = vpop.permute.xlu0 %31 }
  0xb6   :  { %v38_v22 = vsel %vm37_vm7, %v32_v18, %v34_v17 }
  0xb7   :  { %v55_v25 = vmul.f32 %v47_v16, %v38_v22  ;;  %v1217_v22 = vperm.slane %v915_v13, 0 }
  0xb9   :  { %338 = vmatpush.msra.mxu3 %v55_v25  ;;  %v1216_v25 = vperm.slane %v915_v13, 1 }
  0xba   :  { %592 = vmatmul.msk.f32.vlgmr.msra.gmra.mxu3 %vm259_vm8, %v252_v7 }
  0xbc   :  { %v30_v39 = vpop.permute.xlu1 %29 }
  0xbd   :  { %v39_v45 = vsel %vm37_vm7, %v30_v39, %v32_v18  ;;  %v113_v46 = vpop.permute.xlu0 %112 }
  0xbe   :  { %v123_v57 = vsel %vm120_vm4, %v113_v46, %v115_v37  ;;  %v124_v58 = vsel %vm120_vm4, %v853_v23, %v113_v46  ;;  %v54_v34 = vmul.f32 %v46_v26, %v39_v45  ;;  %v109_v37 = vmul.f32 %v101_v48, %v95_v40 }
  0xbf   :  { %v136_v59 = vmul.f32 %v128_v5, %v124_v58  ;;  %v137_v60 = vmul.f32 %v129_v28, %v123_v57  ;;  %v1219_v23 = vperm.slane %v896_v50, 0 }
  0xc0   :  { %318 = vmatpush.msra.mxu2 %v54_v34 }
  0xc1   :  { %275 = vmatpush.msra.mxu0 %v136_v59  ;;  %295 = vmatpush.msra.mxu1 %v137_v60 }
  0xc2   :  { %591 = vmatmul.msk.f32.vlgmr.msra.gmra.mxu2 %vm259_vm8, %v252_v7 }
  0xc3   :  { %276 = vmatpush.msra.mxu0 %v108_v44  ;;  %296 = vmatpush.msra.mxu1 %v109_v37 }
  0xc4   :  { %v28_v63 = vpop.permute.xlu1 %27 }
  0xc5   :  { %v57_v18 = vpop.permute.xlu0 %56  ;;  %v40_v27 = vsel %vm37_vm7, %v28_v63, %v30_v39  ;;  %v41_v40 = vsel %vm37_vm7, %v34_v17, %v28_v63  ;;  %v472_v63 = vld [vmem:[%s1213_s5] sm:$0xf] }
  0xc6   :  { %v67_v45 = vsel %vm64_vm6, %v57_v18, %v59_v56  ;;  %v68_v46 = vsel %vm64_vm6, %v63_v54, %v57_v18  ;;  %v52_v39 = vmul.f32 %v1217_v22, %v41_v40  ;;  %v53_v17 = vmul.f32 %v1216_v25, %v40_v27 }
  0xc7   :  { %v80_v55 = vmul.f32 %v1219_v23, %v68_v46  ;;  %v81_v57 = vmul.f32 %v1218_v61, %v67_v45 }
  0xc9   :  { %277 = vmatpush.msra.mxu0 %v80_v55  ;;  %297 = vmatpush.msra.mxu1 %v81_v57 }
  0xcb   :  { %278 = vmatpush.msra.mxu0 %v52_v39  ;;  %298 = vmatpush.msra.mxu1 %v53_v17 }
  0xcc   :  { %589 = vmatmul.msk.f32.vlgmr.msra.gmra.mxu0 %vm259_vm8, %v252_v7  ;;  %590 = vmatmul.msk.f32.vlgmr.msra.gmra.mxu1 %vm259_vm8, %v252_v7 }
  0xf4   :  { %v257_v54 = vpop.permute.xlu2 %256 }
 0x13d   :  { %v340_v7 = vpop.f32.mrf.mxu3 }
 0x13e   :  { %v986_v60 = vadd.f32 %v340_v7, %v257_v54 }
 0x145   :  { %v320_v44 = vpop.f32.mrf.mxu2 }
 0x146   :  { %v1005_v37 = vadd.f32 %v320_v44, %v257_v54 }
 0x149   :  { %v280_v56 = vpop.f32.mrf.mxu0  ;;  %v300_v58 = vpop.f32.mrf.mxu1 }
 0x14a   :  { %v281_v34 = vadd.f32 %v280_v56, %v257_v54  ;;  %v976_v59 = vadd.f32 %v300_v58, %v257_v54 }
 0x14c   :  { %441 = vrot.lane.b32.xlu1 %v976_v59, %s609_s26  ;;  %439 = vrot.lane.b32.xlu2 %v281_v34, %s609_s26 }
 0x14d   :  { %455 = vrot.lane.b32.xlu0 %v281_v34, %s608_s25 }
 0x154   :  { %425 = vrot.lane.b32.xlu1 %v976_v59, %s610_s29  ;;  %423 = vrot.lane.b32.xlu2 %v281_v34, %s610_s29 }
 0x155   :  { %391 = vrot.lane.b32.xlu0 %v281_v34, %s612_s9 }
 0x15c   :  { %393 = vrot.lane.b32.xlu1 %v976_v59, %s612_s9  ;;  %407 = vrot.lane.b32.xlu2 %v281_v34, %s611_s30 }
 0x15d   :  { %445 = vrot.lane.b32.xlu0 %v986_v60, %s609_s26 }
 0x164   :  { %345 = vrot.lane.b32.xlu1 %v976_v59, %s615_s11  ;;  %457 = vrot.lane.b32.xlu2 %v976_v59, %s608_s25 }
 0x165   :  { %429 = vrot.lane.b32.xlu0 %v986_v60, %s610_s29 }
 0x16c   :  { %461 = vrot.lane.b32.xlu1 %v986_v60, %s608_s25  ;;  %409 = vrot.lane.b32.xlu2 %v976_v59, %s611_s30 }
 0x16d   :  { %413 = vrot.lane.b32.xlu0 %v986_v60, %s611_s30 }
 0x174   :  { %459 = vrot.lane.b32.xlu1 %v1005_v37, %s608_s25  ;;  %377 = vrot.lane.b32.xlu2 %v976_v59, %s613_s1 }
 0x175   :  { %411 = vrot.lane.b32.xlu0 %v1005_v37, %s611_s30 }
 0x17c   :  { %443 = vrot.lane.b32.xlu1 %v1005_v37, %s609_s26  ;;  %361 = vrot.lane.b32.xlu2 %v976_v59, %s614_s10 }
 0x17d   :  { %397 = vrot.lane.b32.xlu0 %v986_v60, %s612_s9 }
 0x184   :  { %427 = vrot.lane.b32.xlu1 %v1005_v37, %s610_s29  ;;  %395 = vrot.lane.b32.xlu2 %v1005_v37, %s612_s9 }
 0x185   :  { %381 = vrot.lane.b32.xlu0 %v986_v60, %s613_s1 }
 0x18c   :  { %365 = vrot.lane.b32.xlu1 %v986_v60, %s614_s10  ;;  %379 = vrot.lane.b32.xlu2 %v1005_v37, %s613_s1 }
 0x18d   :  { %363 = vrot.lane.b32.xlu0 %v1005_v37, %s614_s10 }
 0x194   :  { %349 = vrot.lane.b32.xlu1 %v986_v60, %s615_s11  ;;  %375 = vrot.lane.b32.xlu2 %v281_v34, %s613_s1 }
 0x195   :  { %347 = vrot.lane.b32.xlu0 %v1005_v37, %s615_s11 }
 0x19c   :  { %343 = vrot.lane.b32.xlu1 %v281_v34, %s615_s11  ;;  %475 = vperm.xlu2 %606, %v472_v63  }
 0x19d   :  { %359 = vrot.lane.b32.xlu0 %v281_v34, %s614_s10 }
 0x1a6   :  { %v440_v18 = vpop.permute.xlu2 %439 }
 0x1ae   :  { %v424_v27 = vpop.permute.xlu2 %423 }
 0x1b6   :  { %v408_v40 = vpop.permute.xlu2 %407 }
 0x1be   :  { %v442_v45 = vpop.permute.xlu1 %441  ;;  %v458_v46 = vpop.permute.xlu2 %457 }
 0x1bf   :  { %v456_v55 = vpop.permute.xlu0 %455  ;;  %v449_v57 = vsel %vm204_vm1, %v440_v18, %v442_v45 }
 0x1c0   :  { %v465_v39 = vsel %vm232_vm0, %v456_v55, %v458_v46  ;;  %v451_v54 = vmul.f32 %v449_v57, %v212_v51 }
 0x1c1   :  { %v467_v17 = vmul.f32 %v465_v39, %v240_v11 }
 0x1c3   :  { %488 = vmatpush.msrb.mxu0 %v467_v17 }
 0x1c5   :  { %489 = vmatpush.msrb.mxu0 %v451_v54 }
 0x1c6   :  { %v426_v56 = vpop.permute.xlu1 %425  ;;  %v410_v58 = vpop.permute.xlu2 %409 }
 0x1c7   :  { %v433_v7 = vsel %vm176_vm2, %v424_v27, %v426_v56  ;;  %v417_v44 = vsel %vm148_vm3, %v408_v40, %v410_v58  ;;  %v1053_v63 = vpop.permute.xlu0 %391 }
 0x1c8   :  { %v435_v25 = vmul.f32 %v433_v7, %v184_v4  ;;  %v419_v11 = vmul.f32 %v417_v44, %v156_v14 }
 0x1ca   :  { %490 = vmatpush.msrb.mxu0 %v435_v25 }
 0x1cc   :  { %491 = vmatpush.msrb.mxu0 %v419_v11 }
 0x1ce   :  { %v1059_v51 = vpop.permute.xlu1 %393  ;;  %492 = vmatpush.msrb.mxu0 %v281_v34  ;;  %v1061_v57 = vpop.permute.xlu2 %377 }
 0x1cf   :  { %v446_v39 = vpop.permute.xlu0 %445  ;;  %v401_v30 = vsel %vm120_vm4, %v1053_v63, %v1059_v51 }
 0x1d0   :  { %v450_v4 = vsel %vm204_vm1, %v446_v39, %v440_v18 }
 0x1d1   :  { %v454_v44 = vmul.f32 %v450_v4, %v215_v24 }
 0x1d6   :  { %v1063_v17 = vpop.permute.xlu1 %345  ;;  %v1065_v22 = vpop.permute.xlu2 %361 }
 0x1d7   :  { %v430_v54 = vpop.permute.xlu0 %429 }
 0x1d8   :  { %v434_v34 = vsel %vm176_vm2, %v430_v54, %v424_v27 }
 0x1d9   :  { %v438_v18 = vmul.f32 %v434_v34, %v187_v33 }
 0x1de   :  { %v462_v61 = vpop.permute.xlu1 %461  ;;  %v396_v11 = vpop.permute.xlu2 %395 }
 0x1df   :  { %v466_v25 = vsel %vm232_vm0, %v462_v61, %v456_v55  ;;  %v414_v14 = vpop.permute.xlu0 %413 }
 0x1e0   :  { %v470_v7 = vmul.f32 %v466_v25, %v243_v21  ;;  %v418_v23 = vsel %vm148_vm3, %v414_v14, %v408_v40 }
 0x1e1   :  { %v422_v21 = vmul.f32 %v418_v23, %v159_v43 }
 0x1e2   :  { %548 = vmatpush.msrb.mxu3 %v470_v7 }
 0x1e4   :  { %549 = vmatpush.msrb.mxu3 %v454_v44 }
 0x1e6   :  { %v460_v55 = vpop.permute.xlu1 %459  ;;  %550 = vmatpush.msrb.mxu3 %v438_v18  ;;  %v380_v33 = vpop.permute.xlu2 %379 }
 0x1e7   :  { %v463_v27 = vsel %vm232_vm0, %v460_v55, %v462_v61  ;;  %v464_v25 = vsel %vm232_vm0, %v458_v46, %v460_v55  ;;  %v412_v24 = vpop.permute.xlu0 %411 }
 0x1e8   :  { %551 = vmatpush.msrb.mxu3 %v422_v21  ;;  %v468_v40 = vmul.f32 %v464_v25, %v241_v10  ;;  %v469_v4 = vmul.f32 %v463_v27, %v242_v20  ;;  %v415_v34 = vsel %vm148_vm3, %v412_v24, %v414_v14 }
 0x1e9   :  { %v421_v21 = vmul.f32 %v415_v34, %v158_v53 }
 0x1ea   :  { %508 = vmatpush.msrb.mxu1 %v468_v40  ;;  %528 = vmatpush.msrb.mxu2 %v469_v4  ;;  %v1220_v40 = vperm.slane %v896_v50, 0 }
 0x1eb   :  { %552 = vmatpush.msrb.mxu3 %v986_v60 }
 0x1ee   :  { %v444_v43 = vpop.permute.xlu1 %443  ;;  %v376_v44 = vpop.permute.xlu2 %375 }
 0x1ef   :  { %v447_v23 = vsel %vm204_vm1, %v444_v43, %v446_v39  ;;  %v448_v61 = vsel %vm204_vm1, %v442_v45, %v444_v43  ;;  %v398_v46 = vpop.permute.xlu0 %397  ;;  %v385_v41 = vsel %vm92_vm5, %v376_v44, %v1061_v57 }
 0x1f0   :  { %v399_v7 = vsel %vm120_vm4, %v396_v11, %v398_v46  ;;  %v402_v9 = vsel %vm120_vm4, %v398_v46, %v1053_v63  ;;  %v452_v10 = vmul.f32 %v448_v61, %v213_v52  ;;  %v453_v20 = vmul.f32 %v447_v23, %v214_v32 }
 0x1f1   :  { %v403_v60 = vmul.f32 %v402_v9, %v128_v5  ;;  %v406_v45 = vmul.f32 %v399_v7, %v131_v12  ;;  %v416_v52 = vsel %vm148_vm3, %v410_v58, %v412_v24  ;;  %v1223_v61 = vperm.slane %v915_v13, 1 }
 0x1f2   :  { %509 = vmatpush.msrb.mxu1 %v452_v10  ;;  %529 = vmatpush.msrb.mxu2 %v453_v20 }
 0x1f3   :  { %493 = vmatpush.msrb.mxu0 %v403_v60  ;;  %553 = vmatpush.msrb.mxu3 %v406_v45 }
 0x1f6   :  { %v428_v39 = vpop.permute.xlu1 %427  ;;  %v476_v8 = vpop.permute.xlu2 %475 }
 0x1f7   :  { %v431_v19 = vsel %vm176_vm2, %v428_v39, %v430_v54  ;;  %v432_v32 = vsel %vm176_vm2, %v426_v56, %v428_v39  ;;  %v382_v5 = vpop.permute.xlu0 %381  ;;  %v420_v56 = vmul.f32 %v416_v52, %v157_v15  ;;  %v404_v15 = vmul.f32 %v401_v30, %v129_v28 }
 0x1f8   :  { %v383_v12 = vsel %vm92_vm5, %v380_v33, %v382_v5  ;;  %v386_v18 = vsel %vm92_vm5, %v382_v5, %v376_v44  ;;  %v436_v14 = vmul.f32 %v432_v32, %v185_v6  ;;  %v437_v58 = vmul.f32 %v431_v19, %v186_v42 }
 0x1f9   :  { %v387_v55 = vmul.f32 %v386_v18, %v100_v47  ;;  %v390_v54 = vmul.f32 %v383_v12, %v103_v36  ;;  %v400_v42 = vsel %vm120_vm4, %v1059_v51, %v396_v11  ;;  %v384_v6 = vsel %vm92_vm5, %v1061_v57, %v380_v33 }
 0x1fa   :  { %510 = vmatpush.msrb.mxu1 %v436_v14  ;;  %530 = vmatpush.msrb.mxu2 %v437_v58  ;;  %v405_v36 = vmul.f32 %v400_v42, %v130_v31  ;;  %v389_v63 = vmul.f32 %v384_v6, %v102_v38  ;;  %v1221_v33 = vperm.slane %v896_v50, 1 }
 0x1fb   :  { %494 = vmatpush.msrb.mxu0 %v387_v55  ;;  %554 = vmatpush.msrb.mxu3 %v390_v54 }
 0x1fc   :  { %511 = vmatpush.msrb.mxu1 %v420_v56  ;;  %531 = vmatpush.msrb.mxu2 %v421_v21 }
 0x1fe   :  { %v366_v53 = vpop.permute.xlu1 %365  ;;  %512 = vmatpush.msrb.mxu1 %v976_v59  ;;  %532 = vmatpush.msrb.mxu2 %v1005_v37  ;;  %v388_v59 = vmul.f32 %v385_v41, %v101_v48 }
 0x1ff   :  { %v364_v47 = vpop.permute.xlu0 %363 }
 0x200   :  { %v367_v51 = vsel %vm64_vm6, %v364_v47, %v366_v53  ;;  %v368_v57 = vsel %vm64_vm6, %v1065_v22, %v364_v47  ;;  %513 = vmatpush.msrb.mxu1 %v404_v15  ;;  %533 = vmatpush.msrb.mxu2 %v405_v36 }
 0x201   :  { %v374_v62 = vmul.f32 %v367_v51, %v75_v49  ;;  %v373_v31 = vmul.f32 %v368_v57, %v74_v35  ;;  %v471_v35 = vld [vmem:[%s1214_s4] sm:$0xf] }
 0x202   :  { %514 = vmatpush.msrb.mxu1 %v388_v59  ;;  %534 = vmatpush.msrb.mxu2 %v389_v63 }
 0x203   :  { %555 = vmatpush.msrb.mxu3 %v374_v62 }
 0x204   :  { %535 = vmatpush.msrb.mxu2 %v373_v31 }
 0x206   :  { %v350_v38 = vpop.permute.xlu1 %349 }
 0x207   :  { %v348_v28 = vpop.permute.xlu0 %347 }
 0x208   :  { %v351_v37 = vsel %vm37_vm7, %v348_v28, %v350_v38  ;;  %v352_v29 = vsel %vm37_vm7, %v1063_v17, %v348_v28 }
 0x209   :  { %v357_v48 = vmul.f32 %v352_v29, %v46_v26  ;;  %v358_v49 = vmul.f32 %v351_v37, %v47_v16 }
 0x20b   :  { %536 = vmatpush.msrb.mxu2 %v357_v48  ;;  %556 = vmatpush.msrb.mxu3 %v358_v49 }
 0x20c   :  { %595 = vmatmul.msk.f32.vlgmr.msrb.gmra.mxu2 %vm259_vm8, %v471_v35  ;;  %596 = vmatmul.msk.f32.vlgmr.msrb.gmra.mxu3 %vm259_vm8, %v471_v35 }
 0x20e   :  { %v344_v11 = vpop.permute.xlu1 %343 }
 0x20f   :  { %v360_v27 = vpop.permute.xlu0 %359  ;;  %v353_v25 = vsel %vm37_vm7, %v344_v11, %v1063_v17  ;;  %v354_v26 = vsel %vm37_vm7, %v350_v38, %v344_v11  ;;  %v1222_v17 = vperm.slane %v915_v13, 0 }
 0x210   :  { %v369_v16 = vsel %vm64_vm6, %v360_v27, %v1065_v22  ;;  %v370_v24 = vsel %vm64_vm6, %v366_v53, %v360_v27  ;;  %v356_v46 = vmul.f32 %v353_v25, %v1223_v61 }
 0x211   :  { %v371_v4 = vmul.f32 %v370_v24, %v1220_v40  ;;  %v372_v43 = vmul.f32 %v369_v16, %v1221_v33  ;;  %v355_v23 = vmul.f32 %v354_v26, %v1222_v17 }
 0x213   :  { %495 = vmatpush.msrb.mxu0 %v371_v4  ;;  %515 = vmatpush.msrb.mxu1 %v372_v43 }
 0x215   :  { %496 = vmatpush.msrb.mxu0 %v355_v23  ;;  %516 = vmatpush.msrb.mxu1 %v356_v46 }
 0x216   :  { %593 = vmatmul.msk.f32.vlgmr.msrb.gmra.mxu0 %vm259_vm8, %v471_v35  ;;  %594 = vmatmul.msk.f32.vlgmr.msrb.gmra.mxu1 %vm259_vm8, %v471_v35 }
 0x28f   :  { %v538_v22 = vpop.f32.mrf.mxu2  ;;  %v558_v7 = vpop.f32.mrf.mxu3 }
 0x290   :  { %v539_v9 = vadd.f32 %v538_v22, %v476_v8  ;;  %v559_v50 = vadd.f32 %v558_v7, %v476_v8 }
 0x292   :  { %v564_v10 = vadd.f32 %v559_v50, %v671_v2  ;;  %v563_v45 = vadd.f32 %v539_v9, %v655_v0 }
 0x293   :  { %v498_v20 = vpop.f32.mrf.mxu0  ;;  %v518_v60 = vpop.f32.mrf.mxu1 }
 0x294   :  { %v570_v13 = vrot.slane %v564_v10, 4  ;;  %v499_v39 = vadd.f32 %v498_v20, %v476_v8  ;;  %v519_v34 = vadd.f32 %v518_v60, %v476_v8 }
 0x296   :  { %v573_v52 = vsel %vm571_vm9, %v563_v45, %v570_v13  ;;  %v562_v44 = vadd.f32 %v519_v34, %v688_v3  ;;  %v561_v19 = vadd.f32 %v499_v39, %v660_v1 }
 0x297   :  { %577 = vst [vmem:[%s1215_s6 + $0x8] sm:$0xff] %v573_v52 }
 0x298   :  { %v569_v32 = vrot.slane %v562_v44, 4 }
 0x29a   :  { %v572_v5 = vsel %vm571_vm9, %v561_v19, %v569_v32 }
 0x29b   :  { %576 = vst [vmem:[%s1215_s6] sm:$0xff] %v572_v5 }

// kernel: basic_block_forward.1
= control target key start
LH: loop header
LB: loop body
LE: loop exit
PB: predicated region body
PF: predicated region fallthrough
CT: control target
= control target key end

     0   :  { %s608_s25 = smov 111   ;;  %s609_s26 = smov 112   ;;  %v35_v6 = vlaneseq  ;;  %vm259_vm8 = vcmask 588800   ;;  %vm571_vm9 = vcmask 1043456   ;;  %s1209_s1 = inlined_call_operand.vmem [shape: f32[1,8,512], index: 1, kind: input, shape index: {}]   ;;  %s1210_s0 = inlined_call_operand.vmem [shape: f32[9,1,512], index: 0, kind: input, shape index: {}]   ;;  %s1211_s3 = inlined_call_operand.vmem [shape: f32[8,1], index: 3, kind: input, shape index: {}]   ;;  %s1212_s2 = inlined_call_operand.vmem [shape: f32[8,72], index: 2, kind: input, shape index: {}]   ;;  %s1213_s5 = inlined_call_operand.vmem [shape: f32[4,1], index: 5, kind: input, shape index: {}]   ;;  %s1214_s4 = inlined_call_operand.vmem [shape: f32[4,72], index: 4, kind: input, shape index: {}]   ;;  %s1215_s6 = inlined_call_operand.vmem [shape: f32[1,4,512], index: 6, kind: output, shape index: {}]  }
   0x1   :  { %v655_v0 = vld [vmem:[%s1209_s1 + $0x10] sm:$0xff]  ;;  %v660_v1 = vld [vmem:[%s1209_s1] sm:$0xff]  ;;  %v671_v2 = vld [vmem:[%s1209_s1 + $0x18] sm:$0xff]  ;;  %s610_s29 = smov 113   ;;  %s611_s30 = smov 127  }
   0x2   :  { %228 = vrot.lane.b32.xlu2 %v655_v0, %s608_s25  ;;  %196 = vrot.lane.b32.xlu1 %v660_v1, %s609_s26  ;;  %v688_v3 = vld [vmem:[%s1209_s1 + $0x8] sm:$0xff]  ;;  %s612_s9 = smov 1   ;;  %s613_s1 = smov 15   ;;  %v740_v8 = vand.u32 127, %v35_v6  ;;  %v745_v9 = vld [vmem:[%s1210_s0 + $0x20] sm:$0xf] }
   0x3   :  { %224 = vrot.lane.b32.xlu0 %v660_v1, %s608_s25  ;;  %s614_s10 = smov 16   ;;  %s615_s11 = smov 17   ;;  %v241_v10 = vperm.slane %v745_v9, 1  ;;  %v240_v11 = vperm.slane %v745_v9, 0  ;;  %v761_v19 = vld [vmem:[%s1210_s0 + $0x1c] sm:$0xf] }
   0x4   :  { %vm232_vm0 = vcmp.lt.s32.totalorder %v740_v8, 111  ;;  %vm204_vm1 = vcmp.lt.s32.totalorder %v740_v8, 112  ;;  %v242_v20 = vperm.slane %v745_v9, 2  ;;  %v243_v21 = vperm.slane %v745_v9, 3  ;;  %v780_v30 = vld [vmem:[%s1210_s0 + $0x18] sm:$0xf] }
   0x5   :  { %v215_v24 = vperm.slane %v761_v19, 3  ;;  %v214_v32 = vperm.slane %v761_v19, 2  ;;  %vm176_vm2 = vcmp.lt.s32.totalorder %v740_v8, 113  ;;  %v187_v33 = vperm.slane %v780_v30, 3  ;;  %v801_v41 = vld [vmem:[%s1210_s0 + $0x14] sm:$0xf] }
   0x6   :  { %v186_v42 = vperm.slane %v780_v30, 2  ;;  %vm148_vm3 = vcmp.lt.s32.totalorder %v740_v8, 127  ;;  %v159_v43 = vperm.slane %v801_v41, 3  ;;  %v212_v51 = vperm.slane %v761_v19, 0  ;;  %v834_v62 = vld [vmem:[%s1210_s0 + $0xc] sm:$0xf] }
   0x7   :  { %v213_v52 = vperm.slane %v761_v19, 1  ;;  %v158_v53 = vperm.slane %v801_v41, 2  ;;  %v185_v6 = vperm.slane %v780_v30, 1  ;;  %vm120_vm4 = vcmp.lt.s32.totalorder %v740_v8, 1 }
   0x8   :  { %vm92_vm5 = vcmp.lt.s32.totalorder %v740_v8, 15  ;;  %vm64_vm6 = vcmp.lt.s32.totalorder %v740_v8, 16  ;;  %vm37_vm7 = vcmp.lt.s32.totalorder %v740_v8, 17 }
   0xa   :  { %168 = vrot.lane.b32.xlu2 %v660_v1, %s610_s29  ;;  %202 = vrot.lane.b32.xlu1 %v671_v2, %s609_s26 }
   0xb   :  { %230 = vrot.lane.b32.xlu0 %v671_v2, %s608_s25 }
  0x12   :  { %140 = vrot.lane.b32.xlu2 %v660_v1, %s611_s30  ;;  %200 = vrot.lane.b32.xlu1 %v655_v0, %s609_s26 }
  0x13   :  { %174 = vrot.lane.b32.xlu0 %v671_v2, %s610_s29 }
  0x1a   :  { %226 = vrot.lane.b32.xlu2 %v688_v3, %s608_s25  ;;  %172 = vrot.lane.b32.xlu1 %v655_v0, %s610_s29 }
  0x1b   :  { %146 = vrot.lane.b32.xlu0 %v671_v2, %s611_s30 }
  0x22   :  { %116 = vrot.lane.b32.xlu2 %v655_v0, %s612_s9  ;;  %198 = vrot.lane.b32.xlu1 %v688_v3, %s609_s26 }
  0x23   :  { %144 = vrot.lane.b32.xlu0 %v655_v0, %s611_s30 }
  0x2a   :  { %88 = vrot.lane.b32.xlu2 %v655_v0, %s613_s1  ;;  %170 = vrot.lane.b32.xlu1 %v688_v3, %s610_s29 }
  0x2b   :  { %118 = vrot.lane.b32.xlu0 %v671_v2, %s612_s9 }
  0x32   :  { %142 = vrot.lane.b32.xlu2 %v688_v3, %s611_s30  ;;  %114 = vrot.lane.b32.xlu1 %v688_v3, %s612_s9 }
  0x33   :  { %90 = vrot.lane.b32.xlu0 %v671_v2, %s613_s1 }
  0x3a   :  { %86 = vrot.lane.b32.xlu2 %v688_v3, %s613_s1  ;;  %62 = vrot.lane.b32.xlu1 %v671_v2, %s614_s10 }
  0x3b   :  { %60 = vrot.lane.b32.xlu0 %v655_v0, %s614_s10 }
  0x42   :  { %58 = vrot.lane.b32.xlu2 %v688_v3, %s614_s10  ;;  %33 = vrot.lane.b32.xlu1 %v671_v2, %s615_s11 }
  0x43   :  { %31 = vrot.lane.b32.xlu0 %v655_v0, %s615_s11 }
  0x4a   :  { %84 = vrot.lane.b32.xlu2 %v660_v1, %s613_s1  ;;  %29 = vrot.lane.b32.xlu1 %v688_v3, %s615_s11 }
  0x4b   :  { %112 = vrot.lane.b32.xlu0 %v660_v1, %s612_s9 }
  0x52   :  { %27 = vrot.lane.b32.xlu1 %v660_v1, %s615_s11 }
  0x53   :  { %56 = vrot.lane.b32.xlu0 %v660_v1, %s614_s10 }
  0x5c   :  { %v229_v4 = vpop.permute.xlu2 %228 }
  0x64   :  { %v736_v5 = vpop.permute.xlu2 %168 }
  0x6c   :  { %v738_v7 = vpop.permute.xlu2 %140 }
  0x74   :  { %v227_v12 = vpop.permute.xlu2 %226  ;;  %v197_v13 = vpop.permute.xlu1 %196 }
  0x75   :  { %v225_v14 = vpop.permute.xlu0 %224  ;;  %v234_v15 = vsel %vm232_vm0, %v227_v12, %v229_v4 }
  0x76   :  { %v235_v16 = vsel %vm232_vm0, %v225_v14, %v227_v12  ;;  %v249_v17 = vmul.f32 %v241_v10, %v234_v15  ;;  %v131_v12 = vperm.slane %v834_v62, 3  ;;  %v157_v15 = vperm.slane %v801_v41, 1 }
  0x77   :  { %v248_v18 = vmul.f32 %v240_v11, %v235_v16 }
  0x78   :  { %290 = vmatpush.msra.mxu1 %v249_v17 }
  0x79   :  { %270 = vmatpush.msra.mxu0 %v248_v18 }
  0x7c   :  { %v203_v22 = vpop.permute.xlu1 %202  ;;  %v787_v35 = vpop.permute.xlu2 %116 }
  0x7d   :  { %v231_v23 = vpop.permute.xlu0 %230  ;;  %v208_v25 = vsel %vm204_vm1, %v203_v22, %v197_v13 }
  0x7e   :  { %v233_v26 = vsel %vm232_vm0, %v229_v4, %v231_v23  ;;  %v236_v27 = vsel %vm232_vm0, %v231_v23, %v225_v14  ;;  %v223_v31 = vmul.f32 %v215_v24, %v208_v25  ;;  %v184_v4 = vperm.slane %v780_v30, 0 }
  0x7f   :  { %v250_v28 = vmul.f32 %v242_v20, %v233_v26  ;;  %v251_v29 = vmul.f32 %v243_v21, %v236_v27  ;;  %v156_v14 = vperm.slane %v801_v41, 0 }
  0x81   :  { %310 = vmatpush.msra.mxu2 %v250_v28  ;;  %330 = vmatpush.msra.mxu3 %v251_v29  ;;  %v872_v29 = vld [vmem:[%s1210_s0 + $0x8] sm:$0xf] }
  0x83   :  { %331 = vmatpush.msra.mxu3 %v223_v31  ;;  %v130_v31 = vperm.slane %v834_v62, 2 }
  0x84   :  { %v201_v34 = vpop.permute.xlu1 %200  ;;  %v89_v49 = vpop.permute.xlu2 %88 }
  0x85   :  { %v205_v36 = vsel %vm204_vm1, %v201_v34, %v203_v22  ;;  %v175_v37 = vpop.permute.xlu0 %174 }
  0x86   :  { %v180_v38 = vsel %vm176_vm2, %v175_v37, %v736_v5  ;;  %v222_v39 = vmul.f32 %v214_v32, %v205_v36  ;;  %v103_v36 = vperm.slane %v872_v29, 3 }
  0x87   :  { %v195_v40 = vmul.f32 %v187_v33, %v180_v38  ;;  %v102_v38 = vperm.slane %v872_v29, 2 }
  0x88   :  { %311 = vmatpush.msra.mxu2 %v222_v39 }
  0x89   :  { %332 = vmatpush.msra.mxu3 %v195_v40 }
  0x8c   :  { %v173_v44 = vpop.permute.xlu1 %172  ;;  %v143_v63 = vpop.permute.xlu2 %142 }
  0x8d   :  { %v177_v45 = vsel %vm176_vm2, %v173_v44, %v175_v37  ;;  %v147_v46 = vpop.permute.xlu0 %146  ;;  %v151_v16 = vsel %vm148_vm3, %v738_v7, %v143_v63 }
  0x8e   :  { %v152_v47 = vsel %vm148_vm3, %v147_v46, %v738_v7  ;;  %v194_v48 = vmul.f32 %v186_v42, %v177_v45 }
  0x8f   :  { %v167_v50 = vmul.f32 %v159_v43, %v152_v47 }
  0x90   :  { %312 = vmatpush.msra.mxu2 %v194_v48 }
  0x91   :  { %333 = vmatpush.msra.mxu3 %v167_v50  ;;  %v896_v50 = vld [vmem:[%s1210_s0 + $0x4] sm:$0xf] }
  0x93   :  { %334 = vmatpush.msra.mxu3 %v671_v2 }
  0x94   :  { %v199_v54 = vpop.permute.xlu1 %198 }
  0x95   :  { %v206_v55 = vsel %vm204_vm1, %v199_v54, %v201_v34  ;;  %v207_v56 = vsel %vm204_vm1, %v197_v13, %v199_v54  ;;  %v145_v57 = vpop.permute.xlu0 %144  ;;  %v87_v34 = vpop.permute.xlu2 %86 }
  0x96   :  { %v149_v58 = vsel %vm148_vm3, %v145_v57, %v147_v46  ;;  %v220_v59 = vmul.f32 %v212_v51, %v207_v56  ;;  %v221_v60 = vmul.f32 %v213_v52, %v206_v55  ;;  %v150_v17 = vsel %vm148_vm3, %v143_v63, %v145_v57  ;;  %v253_v55 = vld [vmem:[%s1211_s3] sm:$0xff] }
  0x97   :  { %v166_v61 = vmul.f32 %v158_v53, %v149_v58  ;;  %v165_v28 = vmul.f32 %v157_v15, %v150_v17  ;;  %v94_v39 = vsel %vm92_vm5, %v87_v34, %v89_v49  ;;  %v616_v58 = vmov 0  }
  0x98   :  { %271 = vmatpush.msra.mxu0 %v220_v59  ;;  %291 = vmatpush.msra.mxu1 %v221_v60  ;;  %v110_v48 = vmul.f32 %v102_v38, %v94_v39 }
  0x99   :  { %313 = vmatpush.msra.mxu2 %v166_v61  ;;  %606 = vset.pattern.permute.xlu2 %v616_v58 }
  0x9a   :  { %607 = vset.pattern.permute.xlu0 %v616_v58  ;;  %256 = vperm.xlu2 %606, %v253_v55  }
  0x9b   :  { %314 = vmatpush.msra.mxu2 %v655_v0 }
  0x9c   :  { %v171_v13 = vpop.permute.xlu1 %170 }
  0x9d   :  { %v178_v18 = vsel %vm176_vm2, %v171_v13, %v173_v44  ;;  %v179_v22 = vsel %vm176_vm2, %v736_v5, %v171_v13  ;;  %v853_v23 = vpop.permute.xlu0 %118  ;;  %v164_v5 = vmul.f32 %v156_v14, %v151_v16  ;;  %v59_v56 = vpop.permute.xlu2 %58  ;;  %v915_v13 = vld [vmem:[%s1210_s0] sm:$0xf] }
  0x9e   :  { %v121_v25 = vsel %vm120_vm4, %v787_v35, %v853_v23  ;;  %v192_v7 = vmul.f32 %v184_v4, %v179_v22  ;;  %v193_v26 = vmul.f32 %v185_v6, %v178_v18  ;;  %v47_v16 = vperm.slane %v915_v13, 3 }
  0x9f   :  { %v139_v27 = vmul.f32 %v131_v12, %v121_v25 }
  0xa0   :  { %272 = vmatpush.msra.mxu0 %v192_v7  ;;  %292 = vmatpush.msra.mxu1 %v193_v26  ;;  %v252_v7 = vld [vmem:[%s1212_s2] sm:$0xff]  ;;  %v46_v26 = vperm.slane %v915_v13, 2 }
  0xa1   :  { %335 = vmatpush.msra.mxu3 %v139_v27 }
  0xa2   :  { %273 = vmatpush.msra.mxu0 %v164_v5  ;;  %293 = vmatpush.msra.mxu1 %v165_v28  ;;  %v128_v5 = vperm.slane %v834_v62, 0  ;;  %v129_v28 = vperm.slane %v834_v62, 1 }
  0xa4   :  { %v115_v37 = vpop.permute.xlu1 %114  ;;  %274 = vmatpush.msra.mxu0 %v660_v1  ;;  %294 = vmatpush.msra.mxu1 %v688_v3 }
  0xa5   :  { %v122_v40 = vsel %vm120_vm4, %v115_v37, %v787_v35  ;;  %v91_v44 = vpop.permute.xlu0 %90  ;;  %v74_v35 = vperm.slane %v896_v50, 2  ;;  %v85_v27 = vpop.permute.xlu2 %84 }
  0xa6   :  { %v93_v45 = vsel %vm92_vm5, %v89_v49, %v91_v44  ;;  %v138_v46 = vmul.f32 %v130_v31, %v122_v40  ;;  %v75_v49 = vperm.slane %v896_v50, 3  ;;  %v95_v40 = vsel %vm92_vm5, %v85_v27, %v87_v34 }
  0xa7   :  { %v111_v47 = vmul.f32 %v103_v36, %v93_v45  ;;  %v96_v55 = vsel %vm92_vm5, %v91_v44, %v85_v27 }
  0xa8   :  { %315 = vmatpush.msra.mxu2 %v138_v46 }
  0xa9   :  { %336 = vmatpush.msra.mxu3 %v111_v47  ;;  %v100_v47 = vperm.slane %v872_v29, 0 }
  0xaa   :  { %316 = vmatpush.msra.mxu2 %v110_v48  ;;  %v101_v48 = vperm.slane %v872_v29, 1 }
  0xab   :  { %v108_v44 = vmul.f32 %v100_v47, %v96_v55 }
  0xac   :  { %v63_v54 = vpop.permute.xlu1 %62 }
  0xad   :  { %v61_v57 = vpop.permute.xlu0 %60 }
  0xae   :  { %v65_v59 = vsel %vm64_vm6, %v61_v57, %v63_v54  ;;  %v66_v60 = vsel %vm64_vm6, %v59_v56, %v61_v57 }
  0xaf   :  { %v82_v61 = vmul.f32 %v74_v35, %v66_v60  ;;  %v83_v63 = vmul.f32 %v75_v49, %v65_v59 }
  0xb1   :  { %317 = vmatpush.msra.mxu2 %v82_v61  ;;  %337 = vmatpush.msra.mxu3 %v83_v63  ;;  %v1218_v61 = vperm.slane %v896_v50, 1 }
  0xb4   :  { %v34_v17 = vpop.permute.xlu1 %33 }
  0xb5   :  { %v32_v18 = vpop.permute.xlu0 %31 }
  0xb6   :  { %v38_v22 = vsel %vm37_vm7, %v32_v18, %v34_v17 }
  0xb7   :  { %v55_v25 = vmul.f32 %v47_v16, %v38_v22  ;;  %v1217_v22 = vperm.slane %v915_v13, 0 }
  0xb9   :  { %338 = vmatpush.msra.mxu3 %v55_v25  ;;  %v1216_v25 = vperm.slane %v915_v13, 1 }
  0xba   :  { %592 = vmatmul.msk.f32.vlgmr.msra.gmra.mxu3 %vm259_vm8, %v252_v7 }
  0xbc   :  { %v30_v39 = vpop.permute.xlu1 %29 }
  0xbd   :  { %v39_v45 = vsel %vm37_vm7, %v30_v39, %v32_v18  ;;  %v113_v46 = vpop.permute.xlu0 %112 }
  0xbe   :  { %v123_v57 = vsel %vm120_vm4, %v113_v46, %v115_v37  ;;  %v124_v58 = vsel %vm120_vm4, %v853_v23, %v113_v46  ;;  %v54_v34 = vmul.f32 %v46_v26, %v39_v45  ;;  %v109_v37 = vmul.f32 %v101_v48, %v95_v40 }
  0xbf   :  { %v136_v59 = vmul.f32 %v128_v5, %v124_v58  ;;  %v137_v60 = vmul.f32 %v129_v28, %v123_v57  ;;  %v1219_v23 = vperm.slane %v896_v50, 0 }
  0xc0   :  { %318 = vmatpush.msra.mxu2 %v54_v34 }
  0xc1   :  { %275 = vmatpush.msra.mxu0 %v136_v59  ;;  %295 = vmatpush.msra.mxu1 %v137_v60 }
  0xc2   :  { %591 = vmatmul.msk.f32.vlgmr.msra.gmra.mxu2 %vm259_vm8, %v252_v7 }
  0xc3   :  { %276 = vmatpush.msra.mxu0 %v108_v44  ;;  %296 = vmatpush.msra.mxu1 %v109_v37 }
  0xc4   :  { %v28_v63 = vpop.permute.xlu1 %27 }
  0xc5   :  { %v57_v18 = vpop.permute.xlu0 %56  ;;  %v40_v27 = vsel %vm37_vm7, %v28_v63, %v30_v39  ;;  %v41_v40 = vsel %vm37_vm7, %v34_v17, %v28_v63  ;;  %v472_v63 = vld [vmem:[%s1213_s5] sm:$0xf] }
  0xc6   :  { %v67_v45 = vsel %vm64_vm6, %v57_v18, %v59_v56  ;;  %v68_v46 = vsel %vm64_vm6, %v63_v54, %v57_v18  ;;  %v52_v39 = vmul.f32 %v1217_v22, %v41_v40  ;;  %v53_v17 = vmul.f32 %v1216_v25, %v40_v27 }
  0xc7   :  { %v80_v55 = vmul.f32 %v1219_v23, %v68_v46  ;;  %v81_v57 = vmul.f32 %v1218_v61, %v67_v45 }
  0xc9   :  { %277 = vmatpush.msra.mxu0 %v80_v55  ;;  %297 = vmatpush.msra.mxu1 %v81_v57 }
  0xcb   :  { %278 = vmatpush.msra.mxu0 %v52_v39  ;;  %298 = vmatpush.msra.mxu1 %v53_v17 }
  0xcc   :  { %589 = vmatmul.msk.f32.vlgmr.msra.gmra.mxu0 %vm259_vm8, %v252_v7  ;;  %590 = vmatmul.msk.f32.vlgmr.msra.gmra.mxu1 %vm259_vm8, %v252_v7 }
  0xf4   :  { %v257_v54 = vpop.permute.xlu2 %256 }
 0x13d   :  { %v340_v7 = vpop.f32.mrf.mxu3 }
 0x13e   :  { %v986_v60 = vadd.f32 %v340_v7, %v257_v54 }
 0x145   :  { %v320_v44 = vpop.f32.mrf.mxu2 }
 0x146   :  { %v1005_v37 = vadd.f32 %v320_v44, %v257_v54 }
 0x149   :  { %v280_v56 = vpop.f32.mrf.mxu0  ;;  %v300_v58 = vpop.f32.mrf.mxu1 }
 0x14a   :  { %v281_v34 = vadd.f32 %v280_v56, %v257_v54  ;;  %v976_v59 = vadd.f32 %v300_v58, %v257_v54 }
 0x14c   :  { %441 = vrot.lane.b32.xlu1 %v976_v59, %s609_s26  ;;  %439 = vrot.lane.b32.xlu2 %v281_v34, %s609_s26 }
 0x14d   :  { %455 = vrot.lane.b32.xlu0 %v281_v34, %s608_s25 }
 0x154   :  { %425 = vrot.lane.b32.xlu1 %v976_v59, %s610_s29  ;;  %423 = vrot.lane.b32.xlu2 %v281_v34, %s610_s29 }
 0x155   :  { %391 = vrot.lane.b32.xlu0 %v281_v34, %s612_s9 }
 0x15c   :  { %393 = vrot.lane.b32.xlu1 %v976_v59, %s612_s9  ;;  %407 = vrot.lane.b32.xlu2 %v281_v34, %s611_s30 }
 0x15d   :  { %445 = vrot.lane.b32.xlu0 %v986_v60, %s609_s26 }
 0x164   :  { %345 = vrot.lane.b32.xlu1 %v976_v59, %s615_s11  ;;  %457 = vrot.lane.b32.xlu2 %v976_v59, %s608_s25 }
 0x165   :  { %429 = vrot.lane.b32.xlu0 %v986_v60, %s610_s29 }
 0x16c   :  { %461 = vrot.lane.b32.xlu1 %v986_v60, %s608_s25  ;;  %409 = vrot.lane.b32.xlu2 %v976_v59, %s611_s30 }
 0x16d   :  { %413 = vrot.lane.b32.xlu0 %v986_v60, %s611_s30 }
 0x174   :  { %459 = vrot.lane.b32.xlu1 %v1005_v37, %s608_s25  ;;  %377 = vrot.lane.b32.xlu2 %v976_v59, %s613_s1 }
 0x175   :  { %411 = vrot.lane.b32.xlu0 %v1005_v37, %s611_s30 }
 0x17c   :  { %443 = vrot.lane.b32.xlu1 %v1005_v37, %s609_s26  ;;  %361 = vrot.lane.b32.xlu2 %v976_v59, %s614_s10 }
 0x17d   :  { %397 = vrot.lane.b32.xlu0 %v986_v60, %s612_s9 }
 0x184   :  { %427 = vrot.lane.b32.xlu1 %v1005_v37, %s610_s29  ;;  %395 = vrot.lane.b32.xlu2 %v1005_v37, %s612_s9 }
 0x185   :  { %381 = vrot.lane.b32.xlu0 %v986_v60, %s613_s1 }
 0x18c   :  { %365 = vrot.lane.b32.xlu1 %v986_v60, %s614_s10  ;;  %379 = vrot.lane.b32.xlu2 %v1005_v37, %s613_s1 }
 0x18d   :  { %363 = vrot.lane.b32.xlu0 %v1005_v37, %s614_s10 }
 0x194   :  { %349 = vrot.lane.b32.xlu1 %v986_v60, %s615_s11  ;;  %375 = vrot.lane.b32.xlu2 %v281_v34, %s613_s1 }
 0x195   :  { %347 = vrot.lane.b32.xlu0 %v1005_v37, %s615_s11 }
 0x19c   :  { %343 = vrot.lane.b32.xlu1 %v281_v34, %s615_s11  ;;  %475 = vperm.xlu2 %606, %v472_v63  }
 0x19d   :  { %359 = vrot.lane.b32.xlu0 %v281_v34, %s614_s10 }
 0x1a6   :  { %v440_v18 = vpop.permute.xlu2 %439 }
 0x1ae   :  { %v424_v27 = vpop.permute.xlu2 %423 }
 0x1b6   :  { %v408_v40 = vpop.permute.xlu2 %407 }
 0x1be   :  { %v442_v45 = vpop.permute.xlu1 %441  ;;  %v458_v46 = vpop.permute.xlu2 %457 }
 0x1bf   :  { %v456_v55 = vpop.permute.xlu0 %455  ;;  %v449_v57 = vsel %vm204_vm1, %v440_v18, %v442_v45 }
 0x1c0   :  { %v465_v39 = vsel %vm232_vm0, %v456_v55, %v458_v46  ;;  %v451_v54 = vmul.f32 %v449_v57, %v212_v51 }
 0x1c1   :  { %v467_v17 = vmul.f32 %v465_v39, %v240_v11 }
 0x1c3   :  { %488 = vmatpush.msrb.mxu0 %v467_v17 }
 0x1c5   :  { %489 = vmatpush.msrb.mxu0 %v451_v54 }
 0x1c6   :  { %v426_v56 = vpop.permute.xlu1 %425  ;;  %v410_v58 = vpop.permute.xlu2 %409 }
 0x1c7   :  { %v433_v7 = vsel %vm176_vm2, %v424_v27, %v426_v56  ;;  %v417_v44 = vsel %vm148_vm3, %v408_v40, %v410_v58  ;;  %v1053_v63 = vpop.permute.xlu0 %391 }
 0x1c8   :  { %v435_v25 = vmul.f32 %v433_v7, %v184_v4  ;;  %v419_v11 = vmul.f32 %v417_v44, %v156_v14 }
 0x1ca   :  { %490 = vmatpush.msrb.mxu0 %v435_v25 }
 0x1cc   :  { %491 = vmatpush.msrb.mxu0 %v419_v11 }
 0x1ce   :  { %v1059_v51 = vpop.permute.xlu1 %393  ;;  %492 = vmatpush.msrb.mxu0 %v281_v34  ;;  %v1061_v57 = vpop.permute.xlu2 %377 }
 0x1cf   :  { %v446_v39 = vpop.permute.xlu0 %445  ;;  %v401_v30 = vsel %vm120_vm4, %v1053_v63, %v1059_v51 }
 0x1d0   :  { %v450_v4 = vsel %vm204_vm1, %v446_v39, %v440_v18 }
 0x1d1   :  { %v454_v44 = vmul.f32 %v450_v4, %v215_v24 }
 0x1d6   :  { %v1063_v17 = vpop.permute.xlu1 %345  ;;  %v1065_v22 = vpop.permute.xlu2 %361 }
 0x1d7   :  { %v430_v54 = vpop.permute.xlu0 %429 }
 0x1d8   :  { %v434_v34 = vsel %vm176_vm2, %v430_v54, %v424_v27 }
 0x1d9   :  { %v438_v18 = vmul.f32 %v434_v34, %v187_v33 }
 0x1de   :  { %v462_v61 = vpop.permute.xlu1 %461  ;;  %v396_v11 = vpop.permute.xlu2 %395 }
 0x1df   :  { %v466_v25 = vsel %vm232_vm0, %v462_v61, %v456_v55  ;;  %v414_v14 = vpop.permute.xlu0 %413 }
 0x1e0   :  { %v470_v7 = vmul.f32 %v466_v25, %v243_v21  ;;  %v418_v23 = vsel %vm148_vm3, %v414_v14, %v408_v40 }
 0x1e1   :  { %v422_v21 = vmul.f32 %v418_v23, %v159_v43 }
 0x1e2   :  { %548 = vmatpush.msrb.mxu3 %v470_v7 }
 0x1e4   :  { %549 = vmatpush.msrb.mxu3 %v454_v44 }
 0x1e6   :  { %v460_v55 = vpop.permute.xlu1 %459  ;;  %550 = vmatpush.msrb.mxu3 %v438_v18  ;;  %v380_v33 = vpop.permute.xlu2 %379 }
 0x1e7   :  { %v463_v27 = vsel %vm232_vm0, %v460_v55, %v462_v61  ;;  %v464_v25 = vsel %vm232_vm0, %v458_v46, %v460_v55  ;;  %v412_v24 = vpop.permute.xlu0 %411 }
 0x1e8   :  { %551 = vmatpush.msrb.mxu3 %v422_v21  ;;  %v468_v40 = vmul.f32 %v464_v25, %v241_v10  ;;  %v469_v4 = vmul.f32 %v463_v27, %v242_v20  ;;  %v415_v34 = vsel %vm148_vm3, %v412_v24, %v414_v14 }
 0x1e9   :  { %v421_v21 = vmul.f32 %v415_v34, %v158_v53 }
 0x1ea   :  { %508 = vmatpush.msrb.mxu1 %v468_v40  ;;  %528 = vmatpush.msrb.mxu2 %v469_v4  ;;  %v1220_v40 = vperm.slane %v896_v50, 0 }
 0x1eb   :  { %552 = vmatpush.msrb.mxu3 %v986_v60 }
 0x1ee   :  { %v444_v43 = vpop.permute.xlu1 %443  ;;  %v376_v44 = vpop.permute.xlu2 %375 }
 0x1ef   :  { %v447_v23 = vsel %vm204_vm1, %v444_v43, %v446_v39  ;;  %v448_v61 = vsel %vm204_vm1, %v442_v45, %v444_v43  ;;  %v398_v46 = vpop.permute.xlu0 %397  ;;  %v385_v41 = vsel %vm92_vm5, %v376_v44, %v1061_v57 }
 0x1f0   :  { %v399_v7 = vsel %vm120_vm4, %v396_v11, %v398_v46  ;;  %v402_v9 = vsel %vm120_vm4, %v398_v46, %v1053_v63  ;;  %v452_v10 = vmul.f32 %v448_v61, %v213_v52  ;;  %v453_v20 = vmul.f32 %v447_v23, %v214_v32 }
 0x1f1   :  { %v403_v60 = vmul.f32 %v402_v9, %v128_v5  ;;  %v406_v45 = vmul.f32 %v399_v7, %v131_v12  ;;  %v416_v52 = vsel %vm148_vm3, %v410_v58, %v412_v24  ;;  %v1223_v61 = vperm.slane %v915_v13, 1 }
 0x1f2   :  { %509 = vmatpush.msrb.mxu1 %v452_v10  ;;  %529 = vmatpush.msrb.mxu2 %v453_v20 }
 0x1f3   :  { %493 = vmatpush.msrb.mxu0 %v403_v60  ;;  %553 = vmatpush.msrb.mxu3 %v406_v45 }
 0x1f6   :  { %v428_v39 = vpop.permute.xlu1 %427  ;;  %v476_v8 = vpop.permute.xlu2 %475 }
 0x1f7   :  { %v431_v19 = vsel %vm176_vm2, %v428_v39, %v430_v54  ;;  %v432_v32 = vsel %vm176_vm2, %v426_v56, %v428_v39  ;;  %v382_v5 = vpop.permute.xlu0 %381  ;;  %v420_v56 = vmul.f32 %v416_v52, %v157_v15  ;;  %v404_v15 = vmul.f32 %v401_v30, %v129_v28 }
 0x1f8   :  { %v383_v12 = vsel %vm92_vm5, %v380_v33, %v382_v5  ;;  %v386_v18 = vsel %vm92_vm5, %v382_v5, %v376_v44  ;;  %v436_v14 = vmul.f32 %v432_v32, %v185_v6  ;;  %v437_v58 = vmul.f32 %v431_v19, %v186_v42 }
 0x1f9   :  { %v387_v55 = vmul.f32 %v386_v18, %v100_v47  ;;  %v390_v54 = vmul.f32 %v383_v12, %v103_v36  ;;  %v400_v42 = vsel %vm120_vm4, %v1059_v51, %v396_v11  ;;  %v384_v6 = vsel %vm92_vm5, %v1061_v57, %v380_v33 }
 0x1fa   :  { %510 = vmatpush.msrb.mxu1 %v436_v14  ;;  %530 = vmatpush.msrb.mxu2 %v437_v58  ;;  %v405_v36 = vmul.f32 %v400_v42, %v130_v31  ;;  %v389_v63 = vmul.f32 %v384_v6, %v102_v38  ;;  %v1221_v33 = vperm.slane %v896_v50, 1 }
 0x1fb   :  { %494 = vmatpush.msrb.mxu0 %v387_v55  ;;  %554 = vmatpush.msrb.mxu3 %v390_v54 }
 0x1fc   :  { %511 = vmatpush.msrb.mxu1 %v420_v56  ;;  %531 = vmatpush.msrb.mxu2 %v421_v21 }
 0x1fe   :  { %v366_v53 = vpop.permute.xlu1 %365  ;;  %512 = vmatpush.msrb.mxu1 %v976_v59  ;;  %532 = vmatpush.msrb.mxu2 %v1005_v37  ;;  %v388_v59 = vmul.f32 %v385_v41, %v101_v48 }
 0x1ff   :  { %v364_v47 = vpop.permute.xlu0 %363 }
 0x200   :  { %v367_v51 = vsel %vm64_vm6, %v364_v47, %v366_v53  ;;  %v368_v57 = vsel %vm64_vm6, %v1065_v22, %v364_v47  ;;  %513 = vmatpush.msrb.mxu1 %v404_v15  ;;  %533 = vmatpush.msrb.mxu2 %v405_v36 }
 0x201   :  { %v374_v62 = vmul.f32 %v367_v51, %v75_v49  ;;  %v373_v31 = vmul.f32 %v368_v57, %v74_v35  ;;  %v471_v35 = vld [vmem:[%s1214_s4] sm:$0xf] }
 0x202   :  { %514 = vmatpush.msrb.mxu1 %v388_v59  ;;  %534 = vmatpush.msrb.mxu2 %v389_v63 }
 0x203   :  { %555 = vmatpush.msrb.mxu3 %v374_v62 }
 0x204   :  { %535 = vmatpush.msrb.mxu2 %v373_v31 }
 0x206   :  { %v350_v38 = vpop.permute.xlu1 %349 }
 0x207   :  { %v348_v28 = vpop.permute.xlu0 %347 }
 0x208   :  { %v351_v37 = vsel %vm37_vm7, %v348_v28, %v350_v38  ;;  %v352_v29 = vsel %vm37_vm7, %v1063_v17, %v348_v28 }
 0x209   :  { %v357_v48 = vmul.f32 %v352_v29, %v46_v26  ;;  %v358_v49 = vmul.f32 %v351_v37, %v47_v16 }
 0x20b   :  { %536 = vmatpush.msrb.mxu2 %v357_v48  ;;  %556 = vmatpush.msrb.mxu3 %v358_v49 }
 0x20c   :  { %595 = vmatmul.msk.f32.vlgmr.msrb.gmra.mxu2 %vm259_vm8, %v471_v35  ;;  %596 = vmatmul.msk.f32.vlgmr.msrb.gmra.mxu3 %vm259_vm8, %v471_v35 }
 0x20e   :  { %v344_v11 = vpop.permute.xlu1 %343 }
 0x20f   :  { %v360_v27 = vpop.permute.xlu0 %359  ;;  %v353_v25 = vsel %vm37_vm7, %v344_v11, %v1063_v17  ;;  %v354_v26 = vsel %vm37_vm7, %v350_v38, %v344_v11  ;;  %v1222_v17 = vperm.slane %v915_v13, 0 }
 0x210   :  { %v369_v16 = vsel %vm64_vm6, %v360_v27, %v1065_v22  ;;  %v370_v24 = vsel %vm64_vm6, %v366_v53, %v360_v27  ;;  %v356_v46 = vmul.f32 %v353_v25, %v1223_v61 }
 0x211   :  { %v371_v4 = vmul.f32 %v370_v24, %v1220_v40  ;;  %v372_v43 = vmul.f32 %v369_v16, %v1221_v33  ;;  %v355_v23 = vmul.f32 %v354_v26, %v1222_v17 }
 0x213   :  { %495 = vmatpush.msrb.mxu0 %v371_v4  ;;  %515 = vmatpush.msrb.mxu1 %v372_v43 }
 0x215   :  { %496 = vmatpush.msrb.mxu0 %v355_v23  ;;  %516 = vmatpush.msrb.mxu1 %v356_v46 }
 0x216   :  { %593 = vmatmul.msk.f32.vlgmr.msrb.gmra.mxu0 %vm259_vm8, %v471_v35  ;;  %594 = vmatmul.msk.f32.vlgmr.msrb.gmra.mxu1 %vm259_vm8, %v471_v35 }
 0x28f   :  { %v538_v22 = vpop.f32.mrf.mxu2  ;;  %v558_v7 = vpop.f32.mrf.mxu3 }
 0x290   :  { %v539_v9 = vadd.f32 %v538_v22, %v476_v8  ;;  %v559_v50 = vadd.f32 %v558_v7, %v476_v8 }
 0x292   :  { %v564_v10 = vadd.f32 %v559_v50, %v671_v2  ;;  %v563_v45 = vadd.f32 %v539_v9, %v655_v0 }
 0x293   :  { %v498_v20 = vpop.f32.mrf.mxu0  ;;  %v518_v60 = vpop.f32.mrf.mxu1 }
 0x294   :  { %v570_v13 = vrot.slane %v564_v10, 4  ;;  %v499_v39 = vadd.f32 %v498_v20, %v476_v8  ;;  %v519_v34 = vadd.f32 %v518_v60, %v476_v8 }
 0x296   :  { %v573_v52 = vsel %vm571_vm9, %v563_v45, %v570_v13  ;;  %v562_v44 = vadd.f32 %v519_v34, %v688_v3  ;;  %v561_v19 = vadd.f32 %v499_v39, %v660_v1 }
 0x297   :  { %577 = vst [vmem:[%s1215_s6 + $0x8] sm:$0xff] %v573_v52 }
 0x298   :  { %v569_v32 = vrot.slane %v562_v44, 4 }
 0x29a   :  { %v572_v5 = vsel %vm571_vm9, %v561_v19, %v569_v32 }
 0x29b   :  { %576 = vst [vmem:[%s1215_s6] sm:$0xff] %v572_v5 }

</bundles_post_ra>
